<compile_context>
chip_gen: v7x
topology: tpu7x:2x2x1
jax: 0.10.0
libtpu: 0.0.40
codegen_flags: <defaults>
</compile_context>

<pallas_src>
import functools

import jax
import jax.numpy as jnp
from jax.experimental import pallas as pl
from jax.experimental.pallas import tpu as pltpu


LANE = 128  # hidden / output feature dims are zero-padded to multiples of this


def _round_up(x, m):
    return -(-x // m) * m


def _default_block_batch(batch):
    """Batch-tile heuristic; always a multiple of the bf16 sublane pack (16 rows)."""
    if batch <= 16:
        # One tiny step: splitting would only duplicate the ~0.8 MB weight DMA.
        return 16
    if batch <= 1024:
        # Split into two tiles so dimension_semantics=("parallel",) actually
        # spans both v7x TensorCores (the grid needs >= 2 steps for that).
        return _round_up(-(-batch // 2), 16)
    # Large batch: 512-row tiles amortize the ~0.35 us per-step overhead while
    # per-step VMEM stays at a few MB (fine on v7x 64 MiB, v5e/v6e 128 MiB).
    return 512


def actor_mlp_kernel(x_ref, w1_ref, w2_ref, w3_ref, b_ref, o_ref):
    """Fused MLP: tanh(relu(relu(x@W1+b1)@W2+b2)@W3+b3) on one batch tile.

    Layers 1-2 run in bf16 with f32 MXU accumulation; layer 3 (small) runs in
    f32.  Biases come from a single f32 slab, sliced at static lane-aligned
    (128-multiple) offsets read off the weight ref shapes.
    """
    n1, n2, n3 = w1_ref.shape[1], w2_ref.shape[1], w3_ref.shape[1]
    b1 = b_ref[:, :n1]
    b2 = b_ref[:, n1:n1 + n2]
    b3 = b_ref[:, n1 + n2:n1 + n2 + n3]

    # Input arrives f32 and lane-narrow (last dim == true state_dim); casting
    # here avoids a separate pad/cast XLA op in the wrapper.  The short K is
    # padded internally by the MXU, so it costs nothing extra.
    x = x_ref[...].astype(jnp.bfloat16)

    h1 = jnp.dot(x, w1_ref[...], preferred_element_type=jnp.float32) + b1
    h1 = jnp.maximum(h1, 0.0).astype(jnp.bfloat16)

    h2 = jnp.dot(h1, w2_ref[...], preferred_element_type=jnp.float32) + b2
    h2 = jnp.maximum(h2, 0.0)  # keep f32: final (smallest) matmul runs in f32

    h3 = jnp.dot(h2, w3_ref[...], preferred_element_type=jnp.float32) + b3
    o_ref[...] = jnp.tanh(h3).astype(o_ref.dtype)  # tanh rides the EUP slot


@functools.partial(
    jax.jit,
    static_argnames=("action_dim", "block_batch", "out_dtype", "single_buffer_weights"),
)
def actor_forward(state, kparams, *, action_dim, block_batch=None,
                  out_dtype=jnp.float32, single_buffer_weights=True):
    """state: [B, state_dim] f32.  kparams: padded params from prepare_actor_params.
    Returns [B, action_dim] in out_dtype (f32 default; bf16 trims HBM writeback
    on v5e where the kernel drifts toward mem-bound)."""
    w1, w2, w3, b = kparams["w1"], kparams["w2"], kparams["w3"], kparams["b"]

    batch, state_dim = state.shape
    assert w1.shape[0] == state_dim, "state_dim mismatch with prepared params"
    ad_p = w3.shape[1]

    if block_batch is None:
        block_batch = _default_block_batch(batch)
    batch_p = _round_up(batch, block_batch)

    # Only the batch axis may need padding (ragged batches); the feature axis
    # is consumed at its true width by the kernel.
    x = state if batch_p == batch else jnp.pad(state, ((0, batch_p - batch), (0, 0)))

    grid = (batch_p // block_batch,)

    # Weights / biases are resident (constant block index across the grid);
    # single-buffer them so the pipeline doesn't reserve useless double buffers.
    pipeline_mode = pl.Buffered(1) if single_buffer_weights else None
    resident = lambda arr: pl.BlockSpec(
        arr.shape, lambda i: (0, 0), pipeline_mode=pipeline_mode)

    flops = 2 * batch_p * (state_dim * w1.shape[1]
                           + w1.shape[1] * w2.shape[1]
                           + w2.shape[1] * ad_p)
    bytes_accessed = (
        (w1.size + w2.size) * 2            # bf16 weights (layers 1-2)
        + (w3.size + b.size) * 4           # f32 layer-3 weight + bias slab
        + batch_p * state_dim * 4          # f32 input tiles
        + batch_p * ad_p * jnp.dtype(out_dtype).itemsize)  # output tiles

    out_p = pl.pallas_call(
        actor_mlp_kernel,
        out_shape=jax.ShapeDtypeStruct((batch_p, ad_p), out_dtype),
        grid=grid,
        in_specs=[
            pl.BlockSpec((block_batch, state_dim), lambda i: (i, 0)),  # x batch tile
            resident(w1), resident(w2), resident(w3), resident(b),
        ],
        out_specs=pl.BlockSpec((block_batch, ad_p), lambda i: (i, 0)),
        compiler_params=pltpu.CompilerParams(
            dimension_semantics=("parallel",),   # shard batch tiles across TCs
            vmem_limit_bytes=32 * 1024 * 1024,   # comfortably within v7x's 64 MiB
        ),
        cost_estimate=pl.CostEstimate(
            flops=flops,
            transcendentals=batch_p * ad_p,
            bytes_accessed=bytes_accessed,
        ),
    )(x, w1, w2, w3, b)

    # Lane-dense padded output; drop padded rows / action lanes here (the slice
    # lives inside this jit, so it fuses into the consumer).
    return out_p[:batch, :action_dim]


def init_actor_params(key, state_dim, action_dim, hidden_dims=(400, 300)):
    """PyTorch nn.Linear default init: U(-1/sqrt(fan_in), +1/sqrt(fan_in)) for
    weight and bias.  Weights stored unpadded f32, layout [in, out] (== W.T)."""
    dims = [state_dim] + list(hidden_dims) + [action_dim]
    params = {}
    for idx in range(len(dims) - 1):
        fan_in, fan_out = dims[idx], dims[idx + 1]
        key, kw, kb = jax.random.split(key, 3)
        bound = float(fan_in) ** -0.5
        params[f"w{idx + 1}"] = jax.random.uniform(
            kw, (fan_in, fan_out), jnp.float32, minval=-bound, maxval=bound)
        params[f"b{idx + 1}"] = jax.random.uniform(
            kb, (1, fan_out), jnp.float32, minval=-bound, maxval=bound)
    return params


def prepare_actor_params(params):
    """Zero-pad hidden/output dims to 128-lane multiples (semantics-preserving),
    cast layers 1-2 to bf16, keep the small layer 3 + all biases in f32, and
    fuse the three biases into one lane-aligned slab."""
    w1, w2, w3 = params["w1"], params["w2"], params["w3"]
    state_dim, h1 = w1.shape
    h2 = w2.shape[1]
    action_dim = w3.shape[1]
    h1_p = _round_up(h1, LANE)
    h2_p = _round_up(h2, LANE)
    ad_p = _round_up(action_dim, LANE)

    # Layer 1 keeps its true input (contraction) dim: the block equals the full
    # array so the (8,128) rule doesn't bite, and the MXU pads short K itself.
    w1p = jnp.zeros((state_dim, h1_p), jnp.bfloat16)
    w1p = w1p.at[:, :h1].set(w1.astype(jnp.bfloat16))
    w2p = jnp.zeros((h1_p, h2_p), jnp.bfloat16)
    w2p = w2p.at[:h1, :h2].set(w2.astype(jnp.bfloat16))
    w3p = jnp.zeros((h2_p, ad_p), jnp.float32)     # ~200 KB; f32 for accuracy
    w3p = w3p.at[:h2, :action_dim].set(w3)

    b = jnp.zeros((1, h1_p + h2_p + ad_p), jnp.float32)
    b = b.at[:, :h1].set(params["b1"])
    b = b.at[:, h1_p:h1_p + h2].set(params["b2"])
    b = b.at[:, h1_p + h2_p:h1_p + h2_p + action_dim].set(params["b3"])

    return {"w1": w1p, "w2": w2p, "w3": w3p, "b": b}


def actor_reference(state, params):
    """Pure-JAX f32 reference (matches the PyTorch module exactly)."""
    x = jnp.maximum(state @ params["w1"] + params["b1"], 0.0)
    x = jnp.maximum(x @ params["w2"] + params["b2"], 0.0)
    return jnp.tanh(x @ params["w3"] + params["b3"])


if __name__ == "__main__":
    key = jax.random.PRNGKey(0)
    key, k_small, k_mid = jax.random.split(key, 3)

    state_dim, action_dim, hidden_dims = 16, 4, (400, 300)  # Network_Actor defaults

    raw_params = init_actor_params(key, state_dim, action_dim, hidden_dims)
    kernel_params = prepare_actor_params(raw_params)

    state_small = jax.random.normal(k_small, (16, state_dim), jnp.float32)
    state_mid = jax.random.normal(k_mid, (40, state_dim), jnp.float32)  # ragged, 2-step grid

    def check(state, single_buffer_weights):
        out = actor_forward(state, kernel_params, action_dim=action_dim,
                            single_buffer_weights=single_buffer_weights)
        out = jax.block_until_ready(out)
        ref = actor_reference(state, raw_params)
        assert out.shape == ref.shape
        max_err = float(jnp.max(jnp.abs(out - ref)))
        # bf16 layers 1-2 vs the f32 reference => loosened tolerance.
        assert jnp.allclose(out, ref, atol=3e-2, rtol=3e-2), (
            f"mismatch vs reference, max abs err = {max_err}")

    try:
        check(state_small, single_buffer_weights=True)
        check(state_mid, single_buffer_weights=True)
    except Exception:
        # This JAX build rejects pl.Buffered(1) on the resident weight blocks;
        # fall back to default double-buffering (identical results, ~0.6 MB more VMEM).
        check(state_small, single_buffer_weights=False)
        check(state_mid, single_buffer_weights=False)

    print("KERNEL_OK")
</pallas_src>

<mosaic_0001>
module attributes {stable_mosaic.version = 11 : i64} {
  func.func @actor_mlp_kernel(%arg0: i32, %arg1: memref<16x16xf32, #tpu.memory_space<vmem>>, %arg2: memref<16x512xbf16, #tpu.memory_space<vmem>>, %arg3: memref<512x384xbf16, #tpu.memory_space<vmem>>, %arg4: memref<384x128xf32, #tpu.memory_space<vmem>>, %arg5: memref<1x1024xf32, #tpu.memory_space<vmem>>, %arg6: memref<16x128xf32, #tpu.memory_space<vmem>>) attributes {dimension_semantics = [#tpu.dimension_semantics<parallel>], iteration_bounds = array<i64: 1>, scalar_prefetch = 0 : i64, scratch_operands = 0 : i64, tpu.core_type = #tpu.core_type<tc>, window_params = [{transform_indices = @transform_0, window_bounds = array<i64: 16, 16>}, {pipeline_mode = #tpu.pipeline_mode<synchronous>, transform_indices = @transform_1, window_bounds = array<i64: 16, 512>}, {pipeline_mode = #tpu.pipeline_mode<synchronous>, transform_indices = @transform_2, window_bounds = array<i64: 512, 384>}, {pipeline_mode = #tpu.pipeline_mode<synchronous>, transform_indices = @transform_3, window_bounds = array<i64: 384, 128>}, {pipeline_mode = #tpu.pipeline_mode<synchronous>, transform_indices = @transform_4, window_bounds = array<i64: 1, 1024>}, {transform_indices = @transform_5, window_bounds = array<i64: 16, 128>}]} {
    %c0 = arith.constant 0 : index
    %c0_0 = arith.constant 0 : index
    %0 = vector.load %arg5[%c0, %c0_0] : memref<1x1024xf32, #tpu.memory_space<vmem>>, vector<1x512xf32>
    %c0_1 = arith.constant 0 : index
    %c512 = arith.constant 512 : index
    %1 = vector.load %arg5[%c0_1, %c512] : memref<1x1024xf32, #tpu.memory_space<vmem>>, vector<1x384xf32>
    %c0_2 = arith.constant 0 : index
    %c896 = arith.constant 896 : index
    %2 = vector.load %arg5[%c0_2, %c896] : memref<1x1024xf32, #tpu.memory_space<vmem>>, vector<1x128xf32>
    %c0_3 = arith.constant 0 : index
    %c0_4 = arith.constant 0 : index
    %3 = vector.load %arg1[%c0_3, %c0_4] : memref<16x16xf32, #tpu.memory_space<vmem>>, vector<16x16xf32>
    %4 = arith.truncf %3 : vector<16x16xf32> to vector<16x16xbf16>
    %c0_5 = arith.constant 0 : index
    %c0_6 = arith.constant 0 : index
    %5 = vector.load %arg2[%c0_5, %c0_6] : memref<16x512xbf16, #tpu.memory_space<vmem>>, vector<16x512xbf16>
    %cst = arith.constant dense<0.000000e+00> : vector<16x512xf32>
    %6 = tpu.matmul %4, %5, %cst {dimension_numbers = #tpu.dot_dimension_numbers<[1], [0], [0], [1], [0, 0, 1, 1], [], []>} : vector<16x16xbf16>, vector<16x512xbf16>, vector<16x512xf32> -> vector<16x512xf32>
    %7 = vector.broadcast %0 : vector<1x512xf32> to vector<16x512xf32>
    %8 = arith.addf %6, %7 : vector<16x512xf32>
    %cst_7 = arith.constant 0.000000e+00 : f32
    %9 = vector.broadcast %cst_7 : f32 to vector<16x512xf32>
    %10 = arith.maximumf %8, %9 : vector<16x512xf32>
    %11 = arith.truncf %10 : vector<16x512xf32> to vector<16x512xbf16>
    %c0_8 = arith.constant 0 : index
    %c0_9 = arith.constant 0 : index
    %12 = vector.load %arg3[%c0_8, %c0_9] : memref<512x384xbf16, #tpu.memory_space<vmem>>, vector<512x384xbf16>
    %cst_10 = arith.constant dense<0.000000e+00> : vector<16x384xf32>
    %13 = tpu.matmul %11, %12, %cst_10 {dimension_numbers = #tpu.dot_dimension_numbers<[1], [0], [0], [1], [0, 0, 1, 1], [], []>} : vector<16x512xbf16>, vector<512x384xbf16>, vector<16x384xf32> -> vector<16x384xf32>
    %14 = vector.broadcast %1 : vector<1x384xf32> to vector<16x384xf32>
    %15 = arith.addf %13, %14 : vector<16x384xf32>
    %cst_11 = arith.constant 0.000000e+00 : f32
    %16 = vector.broadcast %cst_11 : f32 to vector<16x384xf32>
    %17 = arith.maximumf %15, %16 : vector<16x384xf32>
    %c0_12 = arith.constant 0 : index
    %c0_13 = arith.constant 0 : index
    %18 = vector.load %arg4[%c0_12, %c0_13] : memref<384x128xf32, #tpu.memory_space<vmem>>, vector<384x128xf32>
    %cst_14 = arith.constant dense<0.000000e+00> : vector<16x128xf32>
    %19 = tpu.matmul %17, %18, %cst_14 {dimension_numbers = #tpu.dot_dimension_numbers<[1], [0], [0], [1], [0, 0, 1, 1], [], []>} : vector<16x384xf32>, vector<384x128xf32>, vector<16x128xf32> -> vector<16x128xf32>
    %20 = vector.broadcast %2 : vector<1x128xf32> to vector<16x128xf32>
    %21 = arith.addf %19, %20 : vector<16x128xf32>
    %22 = math.tanh %21 : vector<16x128xf32>
    %c0_15 = arith.constant 0 : index
    %c0_16 = arith.constant 0 : index
    %23 = vector.load %arg6[%c0_15, %c0_16] : memref<16x128xf32, #tpu.memory_space<vmem>>, vector<16x128xf32>
    tpu.vector_store %arg6[%c0_15, %c0_16], %22 {strides = array<i32>} : memref<16x128xf32, #tpu.memory_space<vmem>>, vector<16x128xf32>,
    return
  }
  func.func @transform_0(%arg0: i32) -> (i32, i32) {
    %c0_i32 = arith.constant 0 : i32
    %c0_i32_0 = arith.constant 0 : i32
    return %arg0, %c0_i32 : i32, i32
  }
  func.func @transform_1(%arg0: i32) -> (i32, i32) {
    %c0_i32 = arith.constant 0 : i32
    %c0_i32_0 = arith.constant 0 : i32
    %c0_i32_1 = arith.constant 0 : i32
    return %c0_i32, %c0_i32_0 : i32, i32
  }
  func.func @transform_2(%arg0: i32) -> (i32, i32) {
    %c0_i32 = arith.constant 0 : i32
    %c0_i32_0 = arith.constant 0 : i32
    %c0_i32_1 = arith.constant 0 : i32
    return %c0_i32, %c0_i32_0 : i32, i32
  }
  func.func @transform_3(%arg0: i32) -> (i32, i32) {
    %c0_i32 = arith.constant 0 : i32
    %c0_i32_0 = arith.constant 0 : i32
    %c0_i32_1 = arith.constant 0 : i32
    return %c0_i32, %c0_i32_0 : i32, i32
  }
  func.func @transform_4(%arg0: i32) -> (i32, i32) {
    %c0_i32 = arith.constant 0 : i32
    %c0_i32_0 = arith.constant 0 : i32
    %c0_i32_1 = arith.constant 0 : i32
    return %c0_i32, %c0_i32_0 : i32, i32
  }
  func.func @transform_5(%arg0: i32) -> (i32, i32) {
    %c0_i32 = arith.constant 0 : i32
    %c0_i32_0 = arith.constant 0 : i32
    return %arg0, %c0_i32 : i32, i32
  }
}

module attributes {stable_mosaic.version = 11 : i64} {
  func.func @actor_mlp_kernel(%arg0: i32, %arg1: memref<16x16xf32, #tpu.memory_space<vmem>>, %arg2: memref<16x512xbf16, #tpu.memory_space<vmem>>, %arg3: memref<512x384xbf16, #tpu.memory_space<vmem>>, %arg4: memref<384x128xf32, #tpu.memory_space<vmem>>, %arg5: memref<1x1024xf32, #tpu.memory_space<vmem>>, %arg6: memref<16x128xf32, #tpu.memory_space<vmem>>) attributes {dimension_semantics = [#tpu.dimension_semantics<parallel>], iteration_bounds = array<i64: 1>, scalar_prefetch = 0 : i64, scratch_operands = 0 : i64, tpu.core_type = #tpu.core_type<tc>, window_params = [{transform_indices = @transform_0, window_bounds = array<i64: 16, 16>}, {pipeline_mode = #tpu.pipeline_mode<synchronous>, transform_indices = @transform_1, window_bounds = array<i64: 16, 512>}, {pipeline_mode = #tpu.pipeline_mode<synchronous>, transform_indices = @transform_2, window_bounds = array<i64: 512, 384>}, {pipeline_mode = #tpu.pipeline_mode<synchronous>, transform_indices = @transform_3, window_bounds = array<i64: 384, 128>}, {pipeline_mode = #tpu.pipeline_mode<synchronous>, transform_indices = @transform_4, window_bounds = array<i64: 1, 1024>}, {transform_indices = @transform_5, window_bounds = array<i64: 16, 128>}]} {
    %c0 = arith.constant 0 : index
    %c0_0 = arith.constant 0 : index
    %0 = vector.load %arg5[%c0, %c0_0] : memref<1x1024xf32, #tpu.memory_space<vmem>>, vector<1x512xf32>
    %c0_1 = arith.constant 0 : index
    %c512 = arith.constant 512 : index
    %1 = vector.load %arg5[%c0_1, %c512] : memref<1x1024xf32, #tpu.memory_space<vmem>>, vector<1x384xf32>
    %c0_2 = arith.constant 0 : index
    %c896 = arith.constant 896 : index
    %2 = vector.load %arg5[%c0_2, %c896] : memref<1x1024xf32, #tpu.memory_space<vmem>>, vector<1x128xf32>
    %c0_3 = arith.constant 0 : index
    %c0_4 = arith.constant 0 : index
    %3 = vector.load %arg1[%c0_3, %c0_4] : memref<16x16xf32, #tpu.memory_space<vmem>>, vector<16x16xf32>
    %4 = arith.truncf %3 : vector<16x16xf32> to vector<16x16xbf16>
    %c0_5 = arith.constant 0 : index
    %c0_6 = arith.constant 0 : index
    %5 = vector.load %arg2[%c0_5, %c0_6] : memref<16x512xbf16, #tpu.memory_space<vmem>>, vector<16x512xbf16>
    %cst = arith.constant dense<0.000000e+00> : vector<16x512xf32>
    %6 = tpu.matmul %4, %5, %cst {dimension_numbers = #tpu.dot_dimension_numbers<[1], [0], [0], [1], [0, 0, 1, 1], [], []>} : vector<16x16xbf16>, vector<16x512xbf16>, vector<16x512xf32> -> vector<16x512xf32>
    %7 = vector.broadcast %0 : vector<1x512xf32> to vector<16x512xf32>
    %8 = arith.addf %6, %7 : vector<16x512xf32>
    %cst_7 = arith.constant 0.000000e+00 : f32
    %9 = vector.broadcast %cst_7 : f32 to vector<16x512xf32>
    %10 = arith.maximumf %8, %9 : vector<16x512xf32>
    %11 = arith.truncf %10 : vector<16x512xf32> to vector<16x512xbf16>
    %c0_8 = arith.constant 0 : index
    %c0_9 = arith.constant 0 : index
    %12 = vector.load %arg3[%c0_8, %c0_9] : memref<512x384xbf16, #tpu.memory_space<vmem>>, vector<512x384xbf16>
    %cst_10 = arith.constant dense<0.000000e+00> : vector<16x384xf32>
    %13 = tpu.matmul %11, %12, %cst_10 {dimension_numbers = #tpu.dot_dimension_numbers<[1], [0], [0], [1], [0, 0, 1, 1], [], []>} : vector<16x512xbf16>, vector<512x384xbf16>, vector<16x384xf32> -> vector<16x384xf32>
    %14 = vector.broadcast %1 : vector<1x384xf32> to vector<16x384xf32>
    %15 = arith.addf %13, %14 : vector<16x384xf32>
    %cst_11 = arith.constant 0.000000e+00 : f32
    %16 = vector.broadcast %cst_11 : f32 to vector<16x384xf32>
    %17 = arith.maximumf %15, %16 : vector<16x384xf32>
    %c0_12 = arith.constant 0 : index
    %c0_13 = arith.constant 0 : index
    %18 = vector.load %arg4[%c0_12, %c0_13] : memref<384x128xf32, #tpu.memory_space<vmem>>, vector<384x128xf32>
    %cst_14 = arith.constant dense<0.000000e+00> : vector<16x128xf32>
    %19 = tpu.matmul %17, %18, %cst_14 {dimension_numbers = #tpu.dot_dimension_numbers<[1], [0], [0], [1], [0, 0, 1, 1], [], []>} : vector<16x384xf32>, vector<384x128xf32>, vector<16x128xf32> -> vector<16x128xf32>
    %20 = vector.broadcast %2 : vector<1x128xf32> to vector<16x128xf32>
    %21 = arith.addf %19, %20 : vector<16x128xf32>
    %22 = math.tanh %21 : vector<16x128xf32>
    %c0_15 = arith.constant 0 : index
    %c0_16 = arith.constant 0 : index
    %23 = vector.load %arg6[%c0_15, %c0_16] : memref<16x128xf32, #tpu.memory_space<vmem>>, vector<16x128xf32>
    tpu.vector_store %arg6[%c0_15, %c0_16], %22 {strides = array<i32>} : memref<16x128xf32, #tpu.memory_space<vmem>>, vector<16x128xf32>,
    return
  }
  func.func @transform_0(%arg0: i32) -> (i32, i32) {
    %c0_i32 = arith.constant 0 : i32
    %c0_i32_0 = arith.constant 0 : i32
    return %arg0, %c0_i32 : i32, i32
  }
  func.func @transform_1(%arg0: i32) -> (i32, i32) {
    %c0_i32 = arith.constant 0 : i32
    %c0_i32_0 = arith.constant 0 : i32
    %c0_i32_1 = arith.constant 0 : i32
    return %c0_i32, %c0_i32_0 : i32, i32
  }
  func.func @transform_2(%arg0: i32) -> (i32, i32) {
    %c0_i32 = arith.constant 0 : i32
    %c0_i32_0 = arith.constant 0 : i32
    %c0_i32_1 = arith.constant 0 : i32
    return %c0_i32, %c0_i32_0 : i32, i32
  }
  func.func @transform_3(%arg0: i32) -> (i32, i32) {
    %c0_i32 = arith.constant 0 : i32
    %c0_i32_0 = arith.constant 0 : i32
    %c0_i32_1 = arith.constant 0 : i32
    return %c0_i32, %c0_i32_0 : i32, i32
  }
  func.func @transform_4(%arg0: i32) -> (i32, i32) {
    %c0_i32 = arith.constant 0 : i32
    %c0_i32_0 = arith.constant 0 : i32
    %c0_i32_1 = arith.constant 0 : i32
    return %c0_i32, %c0_i32_0 : i32, i32
  }
  func.func @transform_5(%arg0: i32) -> (i32, i32) {
    %c0_i32 = arith.constant 0 : i32
    %c0_i32_0 = arith.constant 0 : i32
    return %arg0, %c0_i32 : i32, i32
  }
}

</mosaic_0001>

<bundles_post_ra>
// kernel: actor_forward.1
= control target key start
LH: loop header
LB: loop body
LE: loop exit
PB: predicated region body
PF: predicated region fallthrough
CT: control target
= control target key end

     0   :  { %10 = vsyncpa [#allocation3], 0  ;;  %s1991_s0 = inlined_call_operand.hbm [shape: f32[16,16], index: 0, kind: input, shape index: {}]   ;;  %s1992_s1 = inlined_call_operand.hbm [shape: bf16[16,512], index: 1, kind: input, shape index: {}]   ;;  %s1993_s2 = inlined_call_operand.hbm [shape: bf16[512,384], index: 2, kind: input, shape index: {}]   ;;  %s1994_s3 = inlined_call_operand.hbm [shape: f32[384,128], index: 3, kind: input, shape index: {}]   ;;  %s1995_s4 = inlined_call_operand.hbm [shape: f32[1,1024], index: 4, kind: input, shape index: {}]   ;;  %s1996_s5 = inlined_call_operand.vmem [shape: f32[16,128], index: 5, kind: output, shape index: {}]  }
   0x1   :  { %11 = vsyncpa [#allocation5], 0 }
   0x2   :  { %12 = vsyncpa [#allocation8], 0  ;;  %s1861_s18 = smov [#allocation4]   ;;  %s1745_s22 = scalar_lea.hbm %s1992_s1, 512 }
   0x3   :  { %s30_s19 = sshll.u32 %s1861_s18, 4  ;;  %p1746_p0 = scmp.ne.s32.totalorder %s1992_s1, %s1745_s22  ;;  %s31_s19 = int_to_ptr.vmem [resolvable:$true] %s30_s19 }
   0x4   :  { %p1749_p1 = scmp.lt.u32.totalorder %s1745_s22, %s1992_s1 }
   0x6   :  { %p1751_p2 = pnand %p1749_p1, %p1746_p0 }
   0x8   :  { %1754 = shalt.err (!%p1751_p2)
}
   0x9   :  { %s1755_s27 = scalar_lea.vmem %s31_s19, 512  ;;  %p1760_p4 = scmp.lt.s32.totalorder %s31_s19, %s31_s19 }
   0xa   :  { %p1756_p3 = scmp.ne.s32.totalorder %s31_s19, %s1755_s27  ;;  %p1761_p5 = scmp.lt.s32.totalorder %s1755_s27, %s1755_s27 }
   0xc   :  { %p1762_p6 = por %p1761_p5, %p1760_p4 }
   0xe   :  { %p1763_p7 = pnand %p1762_p6, %p1756_p3 }
  0x10   :  { %1766 = shalt.err (!%p1763_p7)
}
  0x11   :  { %s1862_s28 = smov 256   ;;  %s1863_s29 = smov 16  }
  0x12   :  { %36 = dma.hbm_to_vmem [thread:$0]  %s1992_s1, 512, %s31_s19, [#allocation5], %s1862_s28, %s1862_s28, %s1863_s29  }
  0x13   :  { %s1864_s7 = smov [#allocation7]   ;;  %s1865_s9 = smov [#allocation2]  }
  0x14   :  { %s54_s8 = sshll.u32 %s1864_s7, 4  ;;  %s18_s10 = sshll.u32 %s1865_s9, 4  ;;  %s55_s8 = int_to_ptr.vmem [resolvable:$true] %s54_s8  ;;  %s19_s10 = int_to_ptr.vmem [resolvable:$true] %s18_s10 }
  0x15   :  { %s1767_s13 = scalar_lea.hbm %s1994_s3, 6144 }
  0x16   :  { %p1768_p8 = scmp.ne.s32.totalorder %s1994_s3, %s1767_s13  ;;  %p1771_p9 = scmp.lt.u32.totalorder %s1767_s13, %s1994_s3 }
  0x18   :  { %p1773_p10 = pnand %p1771_p9, %p1768_p8 }
  0x1a   :  { %1776 = shalt.err (!%p1773_p10)
}
  0x1b   :  { %s1777_s1 = scalar_lea.vmem %s55_s8, 6144  ;;  %p1782_p12 = scmp.lt.s32.totalorder %s55_s8, %s55_s8 }
  0x1c   :  { %p1778_p11 = scmp.ne.s32.totalorder %s55_s8, %s1777_s1  ;;  %p1783_p13 = scmp.lt.s32.totalorder %s1777_s1, %s1777_s1 }
  0x1e   :  { %p1784_p0 = por %p1783_p13, %p1782_p12 }
  0x20   :  { %p1785_p1 = pnand %p1784_p0, %p1778_p11 }
  0x22   :  { %1788 = shalt.err (!%p1785_p1)
}
  0x23   :  { %s1866_s18 = smov 128   ;;  %s1867_s19 = smov 8  }
  0x24   :  { %60 = dma.hbm_to_vmem [thread:$0]  %s1994_s3, 6144, %s55_s8, [#allocation8], %s1866_s18, %s1866_s18, %s1867_s19  }
  0x25   :  { %s1789_s24 = scalar_lea.hbm %s1991_s0, 256 }
  0x26   :  { %p1790_p2 = scmp.ne.s32.totalorder %s1991_s0, %s1789_s24  ;;  %p1793_p3 = scmp.lt.u32.totalorder %s1789_s24, %s1991_s0 }
  0x28   :  { %p1795_p4 = pnand %p1793_p3, %p1790_p2 }
  0x2a   :  { %1798 = shalt.err (!%p1795_p4)
}
  0x2b   :  { %s1799_s29 = scalar_lea.vmem %s19_s10, 256  ;;  %p1804_p6 = scmp.lt.s32.totalorder %s19_s10, %s19_s10 }
  0x2c   :  { %p1800_p5 = scmp.ne.s32.totalorder %s19_s10, %s1799_s29  ;;  %p1805_p7 = scmp.lt.s32.totalorder %s1799_s29, %s1799_s29 }
  0x2e   :  { %p1806_p8 = por %p1805_p7, %p1804_p6 }
  0x30   :  { %p1807_p9 = pnand %p1806_p8, %p1800_p5 }
  0x32   :  { %1810 = shalt.err (!%p1807_p9)
}
  0x33   :  { %24 = dma.hbm_to_vmem [thread:$0]  %s1991_s0, 256, %s19_s10, [#allocation3], %s1866_s18, %s1866_s18, %s1867_s19  }
  0x34   :  { %s1868_s6 = smov [#allocation6]   ;;  %s1811_s11 = scalar_lea.hbm %s1993_s2, 12288 }
  0x35   :  { %s42_s7 = sshll.u32 %s1868_s6, 4  ;;  %p1812_p10 = scmp.ne.s32.totalorder %s1993_s2, %s1811_s11  ;;  %s43_s7 = int_to_ptr.vmem [resolvable:$true] %s42_s7 }
  0x36   :  { %p1815_p11 = scmp.lt.u32.totalorder %s1811_s11, %s1993_s2 }
  0x38   :  { %p1817_p12 = pnand %p1815_p11, %p1812_p10 }
  0x3a   :  { %1820 = shalt.err (!%p1817_p12)
}
  0x3b   :  { %s1821_s16 = scalar_lea.vmem %s43_s7, 12288  ;;  %p1826_p0 = scmp.lt.s32.totalorder %s43_s7, %s43_s7 }
  0x3c   :  { %p1822_p13 = scmp.ne.s32.totalorder %s43_s7, %s1821_s16  ;;  %p1827_p1 = scmp.lt.s32.totalorder %s1821_s16, %s1821_s16 }
  0x3e   :  { %p1828_p2 = por %p1827_p1, %p1826_p0 }
  0x40   :  { %p1829_p3 = pnand %p1828_p2, %p1822_p13 }
  0x42   :  { %1832 = shalt.err (!%p1829_p3)
}
  0x43   :  { %s1869_s0 = smov 192   ;;  %s1870_s10 = smov 12  }
  0x44   :  { %48 = dma.hbm_to_vmem [thread:$0]  %s1993_s2, 12288, %s43_s7, [#allocation5], %s1869_s0, %s1869_s0, %s1870_s10  }
  0x45   :  { %s1871_s18 = smov [#allocation9]   ;;  %s1833_s22 = scalar_lea.hbm %s1995_s4, 128 }
  0x46   :  { %s67_s19 = sshll.u32 %s1871_s18, 4  ;;  %p1834_p4 = scmp.ne.s32.totalorder %s1995_s4, %s1833_s22  ;;  %s68_s19 = int_to_ptr.vmem [resolvable:$true] %s67_s19 }
  0x47   :  { %p1837_p5 = scmp.lt.u32.totalorder %s1833_s22, %s1995_s4 }
  0x49   :  { %p1839_p6 = pnand %p1837_p5, %p1834_p4 }
  0x4b   :  { %1842 = shalt.err (!%p1839_p6)
}
  0x4c   :  { %s1843_s27 = scalar_lea.vmem %s68_s19, 128  ;;  %p1848_p8 = scmp.lt.s32.totalorder %s68_s19, %s68_s19 }
  0x4d   :  { %p1844_p7 = scmp.ne.s32.totalorder %s68_s19, %s1843_s27  ;;  %p1849_p9 = scmp.lt.s32.totalorder %s1843_s27, %s1843_s27 }
  0x4f   :  { %p1850_p10 = por %p1849_p9, %p1848_p8 }
  0x51   :  { %p1851_p11 = pnand %p1850_p10, %p1844_p7 }
  0x53   :  { %1854 = shalt.err (!%p1851_p11)
}
  0x54   :  { %70 = dma.hbm_to_vmem [thread:$0]  %s1995_s4, 128, %s68_s19, [#allocation8]  }
  0x55   :  { %1855 = dma.done.wait [#allocation3], 256  }
  0x56   :  { %1856 = vsyncadd [#allocation3], 4294967040 }
  0x57   :  { %1857 = dma.done.wait [#allocation5], 12800  }
  0x58   :  { %1858 = vsyncadd [#allocation5], 4294954496 }
  0x59   :  { %1859 = dma.done.wait [#allocation8], 6272  }
  0x5a   :  { %1860 = vsyncadd [#allocation8], 4294961024  ;;  %v1872_v0 = vmov 0   ;;  %v1607_v1 = vld [vmem:[#allocation4 + $0x4] ss:$16 sps:$4 sm:$0xff]   ;;  %v91_v4 = vld [vmem:[#allocation2 + $0x8] sm:$0xff]  ;;  %v98_v58 = vlaneseq }
  0x5b   :  { %174 = vmatprep.mubr.bf16.mxu0 %v1872_v0  ;;  %217 = vmatprep.mubr.bf16.mxu1 %v1872_v0  ;;  %v1609_v2 = vld [vmem:[#allocation4] ss:$16 sps:$4 sm:$0xff]   ;;  %v1610_v6 = vld [vmem:[#allocation4 + $0xc] ss:$16 sps:$4 sm:$0xff]   ;;  %vm138_vm0 = vcmask 130048  }
  0x5c   :  { %v90_v3 = vld [vmem:[#allocation2] sm:$0xff]  ;;  %142 = vmatprep.subr.bf16.mxu0 %v1607_v1  ;;  %v1612_v7 = vld [vmem:[#allocation4 + $0x8] ss:$16 sps:$4 sm:$0xff]   ;;  %185 = vmatprep.subr.bf16.mxu1 %v1610_v6  ;;  %v1613_v8 = vld [vmem:[#allocation6] ss:$12 sps:$4 sm:$0xff]   ;;  %v1963_v59 = vshrl.u32 %v98_v58, 7 }
  0x5d   :  { %v92_v5 = vpack.c.bf16 %v91_v4, %v90_v3  ;;  %143 = vmatpush1.bf16.msra.mxu0 %v1609_v2  ;;  %v1615_v9 = vld [vmem:[#allocation6 + $0x4] ss:$12 sps:$4 sm:$0xff]   ;;  %186 = vmatpush1.bf16.msra.mxu1 %v1612_v7  ;;  %v1618_v10 = vld [vmem:[#allocation6 + $0x1c] ss:$12 sps:$4 sm:$0xff]   ;;  %v1621_v12 = vld [vmem:[#allocation6 + $0x34] ss:$12 sps:$4 sm:$0xff]  }
  0x5e   :  { %896 = vmatprep.subr.bf16.mxu0 %v1615_v9  ;;  %v1616_v11 = vld [vmem:[#allocation6 + $0x18] ss:$12 sps:$4 sm:$0xff]   ;;  %v1619_v13 = vld [vmem:[#allocation6 + $0x30] ss:$12 sps:$4 sm:$0xff]   ;;  %v1622_v15 = vld [vmem:[#allocation6 + $0x48] ss:$12 sps:$4 sm:$0xff]  }
  0x5f   :  { %v1624_v14 = vld [vmem:[#allocation6 + $0x4c] ss:$12 sps:$4 sm:$0xff]   ;;  %v1627_v16 = vld [vmem:[#allocation6 + $0x64] ss:$12 sps:$4 sm:$0xff]   ;;  %v1640_v17 = vld [vmem:[#allocation6 + $0xc8] ss:$12 sps:$4 sm:$0xff]  }
  0x60   :  { %1289 = vmatmul.mubr.msk.bf16.vlgmr.msra.gmra.mrb[0].mxu0 %vm138_vm0, %v92_v5  ;;  %1290 = vmatmul.mubr.msk.bf16.vlgmr.msra.gmra.mrb[0].mxu1 %vm138_vm0, %v92_v5  ;;  %v1641_v18 = vld [vmem:[#allocation6 + $0x8] ss:$12 sps:$4 sm:$0xff]   ;;  %v1625_v19 = vld [vmem:[#allocation6 + $0x60] ss:$12 sps:$4 sm:$0xff]   ;;  %v1628_v23 = vld [vmem:[#allocation6 + $0x78] ss:$12 sps:$4 sm:$0xff]  }
  0x61   :  { %897 = vmatpush1.bf16.msra.mxu0 %v1613_v8  ;;  %v1630_v20 = vld [vmem:[#allocation6 + $0x7c] ss:$12 sps:$4 sm:$0xff]   ;;  %1388 = vmatprep.subr.bf16.mxu1 %v1640_v17  ;;  %v1645_v21 = vld [vmem:[#allocation6 + $0xe0] ss:$12 sps:$4 sm:$0xff]   ;;  %v1650_v24 = vld [vmem:[#allocation6 + $0xf8] ss:$12 sps:$4 sm:$0xff]  }
  0x62   :  { %898 = vmatprep.subr.bf16.mxu0 %v1618_v10  ;;  %1389 = vmatpush3.bf16.msra.mxu1 %v1641_v18  ;;  %v1646_v22 = vld [vmem:[#allocation6 + $0x20] ss:$12 sps:$4 sm:$0xff]   ;;  %v1651_v25 = vld [vmem:[#allocation6 + $0x38] ss:$12 sps:$4 sm:$0xff]   ;;  %v1631_v27 = vld [vmem:[#allocation6 + $0x90] ss:$12 sps:$4 sm:$0xff]  }
  0x63   :  { %1390 = vmatprep.subr.bf16.mxu1 %v1645_v21  ;;  %v1633_v26 = vld [vmem:[#allocation6 + $0x94] ss:$12 sps:$4 sm:$0xff]   ;;  %v1655_v28 = vld [vmem:[#allocation6 + $0x110] ss:$12 sps:$4 sm:$0xff]   ;;  %v1636_v30 = vld [vmem:[#allocation6 + $0xac] ss:$12 sps:$4 sm:$0xff]  }
  0x64   :  { %v1656_v29 = vld [vmem:[#allocation6 + $0x50] ss:$12 sps:$4 sm:$0xff]   ;;  %v1660_v31 = vld [vmem:[#allocation6 + $0x128] ss:$12 sps:$4 sm:$0xff]   ;;  %v1665_v35 = vld [vmem:[#allocation6 + $0x140] ss:$12 sps:$4 sm:$0xff]  }
  0x65   :  { %899 = vmatpush1.bf16.msra.mxu0 %v1616_v11  ;;  %v1634_v32 = vld [vmem:[#allocation6 + $0xa8] ss:$12 sps:$4 sm:$0xff]   ;;  %v1639_v33 = vld [vmem:[#allocation6 + $0xc4] ss:$12 sps:$4 sm:$0xff]   ;;  %v1637_v36 = vld [vmem:[#allocation6 + $0xc0] ss:$12 sps:$4 sm:$0xff]  }
  0x66   :  { %900 = vmatprep.subr.bf16.mxu0 %v1621_v12  ;;  %1391 = vmatpush3.bf16.msra.mxu1 %v1646_v22  ;;  %v1661_v34 = vld [vmem:[#allocation6 + $0x68] ss:$12 sps:$4 sm:$0xff]   ;;  %v1666_v38 = vld [vmem:[#allocation6 + $0x80] ss:$12 sps:$4 sm:$0xff]   ;;  %v1642_v39 = vld [vmem:[#allocation6 + $0xd8] ss:$12 sps:$4 sm:$0xff]  }
  0x67   :  { %1392 = vmatprep.subr.bf16.mxu1 %v1650_v24  ;;  %v1644_v37 = vld [vmem:[#allocation6 + $0xdc] ss:$12 sps:$4 sm:$0xff]   ;;  %v1649_v40 = vld [vmem:[#allocation6 + $0xf4] ss:$12 sps:$4 sm:$0xff]   ;;  %v1654_v42 = vld [vmem:[#allocation6 + $0x10c] ss:$12 sps:$4 sm:$0xff]  }
  0x68   :  { %v1647_v41 = vld [vmem:[#allocation6 + $0xf0] ss:$12 sps:$4 sm:$0xff]   ;;  %v1652_v43 = vld [vmem:[#allocation6 + $0x108] ss:$12 sps:$4 sm:$0xff]   ;;  %v1657_v45 = vld [vmem:[#allocation6 + $0x120] ss:$12 sps:$4 sm:$0xff]  }
  0x69   :  { %901 = vmatpush1.bf16.msra.mxu0 %v1619_v13  ;;  %v1659_v44 = vld [vmem:[#allocation6 + $0x124] ss:$12 sps:$4 sm:$0xff]   ;;  %v1664_v46 = vld [vmem:[#allocation6 + $0x13c] ss:$12 sps:$4 sm:$0xff]   ;;  %v1669_v48 = vld [vmem:[#allocation6 + $0x154] ss:$12 sps:$4 sm:$0xff]  }
  0x6a   :  { %902 = vmatprep.subr.bf16.mxu0 %v1624_v14  ;;  %1393 = vmatpush3.bf16.msra.mxu1 %v1651_v25  ;;  %v1662_v47 = vld [vmem:[#allocation6 + $0x138] ss:$12 sps:$4 sm:$0xff]   ;;  %v1667_v50 = vld [vmem:[#allocation6 + $0x150] ss:$12 sps:$4 sm:$0xff]   ;;  %v1672_v54 = vld [vmem:[#allocation6 + $0x168] ss:$12 sps:$4 sm:$0xff]  }
  0x6b   :  { %1394 = vmatprep.subr.bf16.mxu1 %v1655_v28  ;;  %v1670_v49 = vld [vmem:[#allocation6 + $0x158] ss:$12 sps:$4 sm:$0xff]   ;;  %v1675_v53 = vld [vmem:[#allocation6 + $0x170] ss:$12 sps:$4 sm:$0xff]   ;;  %v1680_v57 = vld [vmem:[#allocation6 + $0x248] ss:$12 sps:$4 sm:$0xff]  }
  0x6c   :  { %v1671_v51 = vld [vmem:[#allocation6 + $0x98] ss:$12 sps:$4 sm:$0xff]   ;;  %v1676_v55 = vld [vmem:[#allocation6 + $0xb0] ss:$12 sps:$4 sm:$0xff]   ;;  %v100_v60 = vsub.s32 0, %v1963_v59  ;;  %v104_v62 = vsub.s32 1, %v1963_v59 }
  0x6d   :  { %903 = vmatpush1.bf16.msra.mxu0 %v1622_v15  ;;  %v1674_v52 = vld [vmem:[#allocation6 + $0x16c] ss:$12 sps:$4 sm:$0xff]   ;;  %v1679_v56 = vld [vmem:[#allocation6 + $0x184] ss:$12 sps:$4 sm:$0xff]   ;;  %v87_v61 = vld [vmem:[#allocation9] sm:$0xf] }
  0x6e   :  { %904 = vmatprep.subr.bf16.mxu0 %v1627_v16  ;;  %1395 = vmatpush3.bf16.msra.mxu1 %v1656_v29  ;;  %v108_v63 = vsub.s32 2, %v1963_v59  ;;  %v112_v0 = vsub.s32 3, %v1963_v59  ;;  %v101_v1 = vrot.slane %v87_v61, %v100_v60  ;;  %v105_v2 = vrot.slane %v87_v61, %v104_v62  ;;  %v1711_v58 = vld [vmem:[#allocation6 + $0x218] ss:$12 sps:$4 sm:$0xff]  }
  0x6f   :  { %1396 = vmatprep.subr.bf16.mxu1 %v1660_v31  ;;  %v1681_v31 = vld [vmem:[#allocation6 + $0x188] ss:$12 sps:$4 sm:$0xff]  }
  0x70   :  { %v109_v3 = vrot.slane %v87_v61, %v108_v63  ;;  %v113_v5 = vrot.slane %v87_v61, %v112_v0  ;;  %v1714_v61 = vld [vmem:[#allocation6 + $0x22c] ss:$12 sps:$4 sm:$0xff]   ;;  %v1715_v0 = vld [vmem:[#allocation6 + $0x2f0] ss:$12 sps:$4 sm:$0xff]  }
  0x71   :  { %905 = vmatpush1.bf16.msra.mxu0 %v1625_v19 }
  0x72   :  { %906 = vmatprep.subr.bf16.mxu0 %v1630_v20  ;;  %1397 = vmatpush3.bf16.msra.mxu1 %v1661_v34  ;;  %v1685_v34 = vld [vmem:[#allocation6 + $0x260] ss:$12 sps:$4 sm:$0xff]  }
  0x73   :  { %1398 = vmatprep.subr.bf16.mxu1 %v1665_v35 }
  0x75   :  { %907 = vmatpush1.bf16.msra.mxu0 %v1628_v23 }
  0x76   :  { %908 = vmatprep.subr.bf16.mxu0 %v1633_v26  ;;  %1399 = vmatpush3.bf16.msra.mxu1 %v1666_v38  ;;  %v1686_v38 = vld [vmem:[#allocation6 + $0x1a0] ss:$12 sps:$4 sm:$0xff]  }
  0x77   :  { %1400 = vmatprep.subr.bf16.mxu1 %v1670_v49  ;;  %v1697_v49 = vld [vmem:[#allocation6 + $0x1e0] ss:$12 sps:$4 sm:$0xff]  }
  0x79   :  { %909 = vmatpush1.bf16.msra.mxu0 %v1631_v27 }
  0x7a   :  { %910 = vmatprep.subr.bf16.mxu0 %v1636_v30  ;;  %1401 = vmatpush3.bf16.msra.mxu1 %v1671_v51  ;;  %v1677_v30 = vld [vmem:[#allocation6 + $0x180] ss:$12 sps:$4 sm:$0xff]   ;;  %v1704_v51 = vld [vmem:[#allocation6 + $0x1fc] ss:$12 sps:$4 sm:$0xff]  }
  0x7b   :  { %1402 = vmatprep.subr.bf16.mxu1 %v1675_v53  ;;  %v1702_v53 = vld [vmem:[#allocation6 + $0x1f8] ss:$12 sps:$4 sm:$0xff]  }
  0x7d   :  { %911 = vmatpush1.bf16.msra.mxu0 %v1634_v32 }
  0x7e   :  { %912 = vmatprep.subr.bf16.mxu0 %v1639_v33  ;;  %1403 = vmatpush3.bf16.msra.mxu1 %v1676_v55  ;;  %v1684_v33 = vld [vmem:[#allocation6 + $0x19c] ss:$12 sps:$4 sm:$0xff]   ;;  %v1709_v55 = vld [vmem:[#allocation6 + $0x214] ss:$12 sps:$4 sm:$0xff]  }
  0x7f   :  { %1410 = vmatprep.subr.bf16.mxu1 %v1680_v57  ;;  %v1707_v57 = vld [vmem:[#allocation6 + $0x210] ss:$12 sps:$4 sm:$0xff]  }
  0x81   :  { %913 = vmatpush1.bf16.msra.mxu0 %v1637_v36 }
  0x82   :  { %914 = vmatprep.subr.bf16.mxu0 %v1644_v37  ;;  %v1682_v37 = vld [vmem:[#allocation6 + $0x198] ss:$12 sps:$4 sm:$0xff]  }
  0x85   :  { %915 = vmatpush1.bf16.msra.mxu0 %v1642_v39  ;;  %v1689_v39 = vld [vmem:[#allocation6 + $0x1b4] ss:$12 sps:$4 sm:$0xff]  }
  0x86   :  { %916 = vmatprep.subr.bf16.mxu0 %v1649_v40  ;;  %v1690_v40 = vld [vmem:[#allocation6 + $0x278] ss:$12 sps:$4 sm:$0xff]  }
  0x89   :  { %917 = vmatpush1.bf16.msra.mxu0 %v1647_v41  ;;  %v1687_v41 = vld [vmem:[#allocation6 + $0x1b0] ss:$12 sps:$4 sm:$0xff]  }
  0x8a   :  { %918 = vmatprep.subr.bf16.mxu0 %v1654_v42  ;;  %v1691_v42 = vld [vmem:[#allocation6 + $0x1b8] ss:$12 sps:$4 sm:$0xff]  }
  0x8d   :  { %919 = vmatpush1.bf16.msra.mxu0 %v1652_v43  ;;  %v1694_v43 = vld [vmem:[#allocation6 + $0x1cc] ss:$12 sps:$4 sm:$0xff]  }
  0x8e   :  { %920 = vmatprep.subr.bf16.mxu0 %v1659_v44  ;;  %v1695_v44 = vld [vmem:[#allocation6 + $0x290] ss:$12 sps:$4 sm:$0xff]  }
  0x91   :  { %921 = vmatpush1.bf16.msra.mxu0 %v1657_v45  ;;  %v1692_v45 = vld [vmem:[#allocation6 + $0x1c8] ss:$12 sps:$4 sm:$0xff]  }
  0x92   :  { %922 = vmatprep.subr.bf16.mxu0 %v1664_v46  ;;  %v1696_v46 = vld [vmem:[#allocation6 + $0x1d0] ss:$12 sps:$4 sm:$0xff]  }
  0x95   :  { %923 = vmatpush1.bf16.msra.mxu0 %v1662_v47  ;;  %v1699_v47 = vld [vmem:[#allocation6 + $0x1e4] ss:$12 sps:$4 sm:$0xff]  }
  0x96   :  { %924 = vmatprep.subr.bf16.mxu0 %v1669_v48  ;;  %v1700_v48 = vld [vmem:[#allocation6 + $0x2a8] ss:$12 sps:$4 sm:$0xff]  }
  0x99   :  { %925 = vmatpush1.bf16.msra.mxu0 %v1667_v50  ;;  %v1701_v50 = vld [vmem:[#allocation6 + $0x1e8] ss:$12 sps:$4 sm:$0xff]  }
  0x9a   :  { %926 = vmatprep.subr.bf16.mxu0 %v1674_v52  ;;  %v1705_v52 = vld [vmem:[#allocation6 + $0x2c0] ss:$12 sps:$4 sm:$0xff]  }
  0x9d   :  { %927 = vmatpush1.bf16.msra.mxu0 %v1672_v54  ;;  %v1706_v54 = vld [vmem:[#allocation6 + $0x200] ss:$12 sps:$4 sm:$0xff]  }
  0x9e   :  { %939 = vmatprep.subr.bf16.mxu0 %v1679_v56  ;;  %v1710_v56 = vld [vmem:[#allocation6 + $0x2d8] ss:$12 sps:$4 sm:$0xff]  }
 0x133   :  { %v176_v4 = vpop.f32.mrb[0].mxu0  ;;  %v219_v10 = vpop.f32.mrb[0].mxu1 }
 0x134   :  { %v177_v6 = vadd.f32 %v176_v4, %v101_v1  ;;  %v178_v7 = vpop.f32.mrb[1].mxu0  ;;  %v220_v13 = vadd.f32 %v219_v10, %v109_v3  ;;  %v221_v14 = vpop.f32.mrb[1].mxu1  ;;  %v1717_v4 = vld [vmem:[#allocation6 + $0x240] ss:$12 sps:$4 sm:$0xff]   ;;  %v1726_v10 = vld [vmem:[#allocation6 + $0x288] ss:$12 sps:$4 sm:$0xff]  }
 0x135   :  { %v179_v8 = vadd.f32 %v178_v7, %v105_v2  ;;  %v180_v9 = vpop.f32.mrb[2].mxu0  ;;  %v222_v16 = vadd.f32 %v221_v14, %v113_v5  ;;  %v223_v17 = vpop.f32.mrb[2].mxu1  ;;  %v1725_v7 = vld [vmem:[#allocation6 + $0x274] ss:$12 sps:$4 sm:$0xff]   ;;  %v1732_v14 = vld [vmem:[#allocation6 + $0x2b8] ss:$12 sps:$4 sm:$0xff]  }
 0x136   :  { %v181_v11 = vadd.f32 %v180_v9, %v101_v1  ;;  %v182_v12 = vpop.f32.mrb[3].mxu0  ;;  %v228_v18 = vmax.f32 %v177_v6, 0.0  ;;  %v230_v20 = vmax.f32 %v220_v13, 0.0  ;;  %v224_v21 = vadd.f32 %v223_v17, %v109_v3  ;;  %v225_v22 = vpop.f32.mrb[3].mxu1  ;;  %v1712_v1 = vld [vmem:[#allocation6 + $0x228] ss:$12 sps:$4 sm:$0xff]  }
 0x137   :  { %v183_v15 = vadd.f32 %v182_v12, %v105_v2  ;;  %v229_v23 = vmax.f32 %v179_v8, 0.0  ;;  %v231_v25 = vmax.f32 %v222_v16, 0.0  ;;  %v226_v26 = vadd.f32 %v225_v22, %v113_v5  ;;  %v1716_v2 = vld [vmem:[#allocation6 + $0x230] ss:$12 sps:$4 sm:$0xff]   ;;  %v1720_v6 = vld [vmem:[#allocation6 + $0x258] ss:$12 sps:$4 sm:$0xff]  }
 0x138   :  { %v232_v19 = vmax.f32 %v181_v11, 0.0  ;;  %v234_v28 = vmax.f32 %v224_v21, 0.0  ;;  %v1719_v3 = vld [vmem:[#allocation6 + $0x244] ss:$12 sps:$4 sm:$0xff]   ;;  %v1722_v5 = vld [vmem:[#allocation6 + $0x25c] ss:$12 sps:$4 sm:$0xff]  }
 0x139   :  { %v233_v24 = vmax.f32 %v183_v15, 0.0  ;;  %v235_v32 = vmax.f32 %v226_v26, 0.0  ;;  %v1723_v8 = vld [vmem:[#allocation6 + $0x270] ss:$12 sps:$4 sm:$0xff]   ;;  %v1728_v9 = vld [vmem:[#allocation6 + $0x28c] ss:$12 sps:$4 sm:$0xff]  }
 0x13a   :  { %v236_v27 = vpack.c.bf16 %v232_v19, %v228_v18  ;;  %v1975_v35 = vpack.c.bf16 %v234_v28, %v230_v20  ;;  %v1731_v11 = vld [vmem:[#allocation6 + $0x2a4] ss:$12 sps:$4 sm:$0xff]   ;;  %v1729_v12 = vld [vmem:[#allocation6 + $0x2a0] ss:$12 sps:$4 sm:$0xff]   ;;  %v1734_v13 = vld [vmem:[#allocation6 + $0x2bc] ss:$12 sps:$4 sm:$0xff]  }
 0x13b   :  { %v237_v29 = vpack.c.bf16 %v233_v24, %v229_v23  ;;  %v239_v36 = vpack.c.bf16 %v235_v32, %v231_v25  ;;  %v1737_v15 = vld [vmem:[#allocation6 + $0x2d4] ss:$12 sps:$4 sm:$0xff]   ;;  %v1735_v16 = vld [vmem:[#allocation6 + $0x2d0] ss:$12 sps:$4 sm:$0xff]   ;;  %v1740_v17 = vld [vmem:[#allocation6 + $0x2ec] ss:$12 sps:$4 sm:$0xff]  }
 0x13c   :  { %v1738_v18 = vld [vmem:[#allocation6 + $0x2e8] ss:$12 sps:$4 sm:$0xff]   ;;  %v1086_v19 = vld [vmem:[#allocation7 + $0x80] sm:$0xff]  ;;  %v1089_v26 = vld [vmem:[#allocation7 + $0x98] sm:$0xff] }
 0x13d   :  { %928 = vmatprep.mubr.bf16.mxu0 %v237_v29  ;;  %1014 = vmatprep.mubr.bf16.mxu1 %v237_v29  ;;  %v1087_v20 = vld [vmem:[#allocation7 + $0x88] sm:$0xff]  ;;  %v1070_v22 = vld [vmem:[#allocation7] sm:$0xff]  ;;  %v1088_v25 = vld [vmem:[#allocation7 + $0x90] sm:$0xff] }
 0x13e   :  { %929 = vmatmul.mubr.bf16.vlgmr.msra.gmra.mrb[4].mxu0 %v236_v27  ;;  %1015 = vmatmul.mubr.bf16.vlgmr.msra.gmra.mrb[4].mxu1 %v236_v27  ;;  %v1523_v21 = vpack.c.bf16 %v1087_v20, %v1086_v19  ;;  %v1071_v23 = vld [vmem:[#allocation7 + $0x8] sm:$0xff]  ;;  %v1527_v27 = vpack.c.bf16 %v1089_v26, %v1088_v25  ;;  %v1072_v28 = vld [vmem:[#allocation7 + $0x10] sm:$0xff]  ;;  %v1073_v29 = vld [vmem:[#allocation7 + $0x18] sm:$0xff] }
 0x13f   :  { %940 = vmatpush1.bf16.msra.mxu0 %v1677_v30  ;;  %1411 = vmatpush3.bf16.msra.mxu1 %v1681_v31  ;;  %v1525_v24 = vpack.c.bf16 %v1071_v23, %v1070_v22  ;;  %v1090_v30 = vld [vmem:[#allocation7 + $0xa0] sm:$0xff]  ;;  %v1529_v31 = vpack.c.bf16 %v1073_v29, %v1072_v28  ;;  %v1091_v32 = vld [vmem:[#allocation7 + $0xa8] sm:$0xff] }
 0x140   :  { %941 = vmatprep.subr.bf16.mxu0 %v1684_v33  ;;  %1412 = vmatprep.subr.bf16.mxu1 %v1685_v34  ;;  %v1074_v33 = vld [vmem:[#allocation7 + $0x20] sm:$0xff]  ;;  %v1075_v34 = vld [vmem:[#allocation7 + $0x28] sm:$0xff] }
 0x141   :  { %1055 = vmatprep.mubr.bf16.mxu1 %v239_v36  ;;  %971 = vmatprep.mubr.bf16.mxu0 %v239_v36  ;;  %v1092_v36 = vld [vmem:[#allocation7 + $0xb0] sm:$0xff] }
 0x143   :  { %942 = vmatpush1.bf16.msra.mxu0 %v1682_v37  ;;  %1413 = vmatpush3.bf16.msra.mxu1 %v1686_v38  ;;  %v1093_v37 = vld [vmem:[#allocation7 + $0xb8] sm:$0xff]  ;;  %v1533_v38 = vpack.c.bf16 %v1075_v34, %v1074_v33  ;;  %v1104_v34 = vld [vmem:[#allocation7 + $0x110] sm:$0xff] }
 0x144   :  { %943 = vmatprep.subr.bf16.mxu0 %v1689_v39  ;;  %1414 = vmatprep.subr.bf16.mxu1 %v1690_v40  ;;  %v1535_v39 = vpack.c.bf16 %v1093_v37, %v1092_v36  ;;  %v1076_v40 = vld [vmem:[#allocation7 + $0x30] sm:$0xff] }
 0x147   :  { %944 = vmatpush1.bf16.msra.mxu0 %v1687_v41  ;;  %1415 = vmatpush3.bf16.msra.mxu1 %v1691_v42  ;;  %v1077_v41 = vld [vmem:[#allocation7 + $0x38] sm:$0xff]  ;;  %v1094_v42 = vld [vmem:[#allocation7 + $0xc0] sm:$0xff] }
 0x148   :  { %945 = vmatprep.subr.bf16.mxu0 %v1694_v43  ;;  %1416 = vmatprep.subr.bf16.mxu1 %v1695_v44  ;;  %v1095_v43 = vld [vmem:[#allocation7 + $0xc8] sm:$0xff]  ;;  %v1537_v44 = vpack.c.bf16 %v1077_v41, %v1076_v40 }
 0x14b   :  { %946 = vmatpush1.bf16.msra.mxu0 %v1692_v45  ;;  %1417 = vmatpush3.bf16.msra.mxu1 %v1696_v46  ;;  %v1539_v45 = vpack.c.bf16 %v1095_v43, %v1094_v42  ;;  %v1078_v46 = vld [vmem:[#allocation7 + $0x40] sm:$0xff] }
 0x14c   :  { %947 = vmatprep.subr.bf16.mxu0 %v1699_v47  ;;  %1418 = vmatprep.subr.bf16.mxu1 %v1700_v48  ;;  %v1079_v47 = vld [vmem:[#allocation7 + $0x48] sm:$0xff]  ;;  %v1096_v48 = vld [vmem:[#allocation7 + $0xd0] sm:$0xff]  ;;  %v1106_v43 = vld [vmem:[#allocation7 + $0x120] sm:$0xff] }
 0x14f   :  { %948 = vmatpush1.bf16.msra.mxu0 %v1697_v49  ;;  %1419 = vmatpush3.bf16.msra.mxu1 %v1701_v50  ;;  %v1097_v49 = vld [vmem:[#allocation7 + $0xd8] sm:$0xff]  ;;  %v1541_v50 = vpack.c.bf16 %v1079_v47, %v1078_v46 }
 0x150   :  { %949 = vmatprep.subr.bf16.mxu0 %v1704_v51  ;;  %1420 = vmatprep.subr.bf16.mxu1 %v1705_v52  ;;  %v1543_v51 = vpack.c.bf16 %v1097_v49, %v1096_v48  ;;  %v1080_v52 = vld [vmem:[#allocation7 + $0x50] sm:$0xff]  ;;  %v1109_v46 = vld [vmem:[#allocation7 + $0x138] sm:$0xff]  ;;  %v1110_v48 = vld [vmem:[#allocation7 + $0x140] sm:$0xff] }
 0x151   :  { %v1111_v49 = vld [vmem:[#allocation7 + $0x148] sm:$0xff] }
 0x153   :  { %950 = vmatpush1.bf16.msra.mxu0 %v1702_v53  ;;  %1421 = vmatpush3.bf16.msra.mxu1 %v1706_v54  ;;  %v1081_v53 = vld [vmem:[#allocation7 + $0x58] sm:$0xff]  ;;  %v1098_v54 = vld [vmem:[#allocation7 + $0xe0] sm:$0xff] }
 0x154   :  { %951 = vmatprep.subr.bf16.mxu0 %v1709_v55  ;;  %1422 = vmatprep.subr.bf16.mxu1 %v1710_v56  ;;  %v1099_v55 = vld [vmem:[#allocation7 + $0xe8] sm:$0xff]  ;;  %v1545_v56 = vpack.c.bf16 %v1081_v53, %v1080_v52  ;;  %v1113_v52 = vld [vmem:[#allocation7 + $0x158] sm:$0xff] }
 0x157   :  { %952 = vmatpush1.bf16.msra.mxu0 %v1707_v57  ;;  %1423 = vmatpush3.bf16.msra.mxu1 %v1711_v58  ;;  %v1547_v57 = vpack.c.bf16 %v1099_v55, %v1098_v54  ;;  %v1082_v58 = vld [vmem:[#allocation7 + $0x60] sm:$0xff]  ;;  %v1115_v55 = vld [vmem:[#allocation7 + $0x168] sm:$0xff] }
 0x158   :  { %953 = vmatprep.subr.bf16.mxu0 %v1714_v61  ;;  %1424 = vmatprep.subr.bf16.mxu1 %v1715_v0  ;;  %v1083_v61 = vld [vmem:[#allocation7 + $0x68] sm:$0xff]  ;;  %v1114_v54 = vld [vmem:[#allocation7 + $0x160] sm:$0xff] }
 0x159   :  { %v1549_v0 = vpack.c.bf16 %v1083_v61, %v1082_v58  ;;  %v1117_v58 = vld [vmem:[#allocation7 + $0x178] sm:$0xff] }
 0x15b   :  { %954 = vmatpush1.bf16.msra.mxu0 %v1712_v1  ;;  %1425 = vmatpush3.bf16.msra.mxu1 %v1716_v2  ;;  %v1100_v1 = vld [vmem:[#allocation7 + $0xf0] sm:$0xff]  ;;  %v1101_v2 = vld [vmem:[#allocation7 + $0xf8] sm:$0xff] }
 0x15c   :  { %955 = vmatprep.subr.bf16.mxu0 %v1719_v3  ;;  %1524 = vmatprep.subr.bf16.mxu1 %v1523_v21  ;;  %v1551_v3 = vpack.c.bf16 %v1101_v2, %v1100_v1 }
 0x15e   :  { %1056 = vmatmul.mubr.bf16.vlgmr.msra.gmra.mrb[8].mxu1 %v1975_v35 }
 0x15f   :  { %956 = vmatpush1.bf16.msra.mxu0 %v1717_v4  ;;  %1526 = vmatpush3.bf16.msra.mxu1 %v1525_v24  ;;  %v1084_v4 = vld [vmem:[#allocation7 + $0x70] sm:$0xff] }
 0x160   :  { %957 = vmatprep.subr.bf16.mxu0 %v1722_v5  ;;  %1528 = vmatprep.subr.bf16.mxu1 %v1527_v27  ;;  %v1085_v5 = vld [vmem:[#allocation7 + $0x78] sm:$0xff] }
 0x163   :  { %958 = vmatpush1.bf16.msra.mxu0 %v1720_v6  ;;  %1530 = vmatpush3.bf16.msra.mxu1 %v1529_v31  ;;  %v1553_v6 = vpack.c.bf16 %v1085_v5, %v1084_v4 }
 0x164   :  { %959 = vmatprep.subr.bf16.mxu0 %v1725_v7  ;;  %v1102_v7 = vld [vmem:[#allocation7 + $0x100] sm:$0xff] }
 0x167   :  { %960 = vmatpush1.bf16.msra.mxu0 %v1723_v8  ;;  %v1103_v8 = vld [vmem:[#allocation7 + $0x108] sm:$0xff] }
 0x168   :  { %961 = vmatprep.subr.bf16.mxu0 %v1728_v9  ;;  %v1555_v9 = vpack.c.bf16 %v1103_v8, %v1102_v7  ;;  %v1387_v7 = vld [vmem:[#allocation9 + $0x7] ss:$0 sm:$0xff] }
 0x16b   :  { %962 = vmatpush1.bf16.msra.mxu0 %v1726_v10 }
 0x16c   :  { %963 = vmatprep.subr.bf16.mxu0 %v1731_v11 }
 0x16f   :  { %964 = vmatpush1.bf16.msra.mxu0 %v1729_v12 }
 0x170   :  { %965 = vmatprep.subr.bf16.mxu0 %v1734_v13 }
 0x173   :  { %966 = vmatpush1.bf16.msra.mxu0 %v1732_v14 }
 0x174   :  { %967 = vmatprep.subr.bf16.mxu0 %v1737_v15 }
 0x177   :  { %968 = vmatpush1.bf16.msra.mxu0 %v1735_v16  ;;  %v88_v16 = vld [vmem:[#allocation9 + $0x4] sm:$0x7] }
 0x178   :  { %969 = vmatprep.subr.bf16.mxu0 %v1740_v17  ;;  %v380_v17 = vrot.slane %v88_v16, %v108_v63  ;;  %v372_v28 = vrot.slane %v88_v16, %v100_v60  ;;  %v376_v29 = vrot.slane %v88_v16, %v104_v62  ;;  %v1107_v60 = vld [vmem:[#allocation7 + $0x128] sm:$0xff] }
 0x179   :  { %v1563_v62 = vpack.c.bf16 %v1107_v60, %v1106_v43 }
 0x17b   :  { %970 = vmatpush1.bf16.msra.mxu0 %v1738_v18 }
 0x17e   :  { %972 = vmatmul.mubr.bf16.vlgmr.msra.gmra.mrb[4].mxu0 %v1975_v35  ;;  %v1531_v35 = vpack.c.bf16 %v1091_v32, %v1090_v30 }
 0x180   :  { %1532 = vmatprep.subr.bf16.mxu1 %v1531_v35  ;;  %v1105_v35 = vld [vmem:[#allocation7 + $0x118] sm:$0xff] }
 0x181   :  { %1534 = vmatpush3.bf16.msra.mxu1 %v1533_v38  ;;  %v1559_v41 = vpack.c.bf16 %v1105_v35, %v1104_v34 }
 0x182   :  { %1536 = vmatprep.subr.bf16.mxu1 %v1535_v39 }
 0x185   :  { %1538 = vmatpush3.bf16.msra.mxu1 %v1537_v44 }
 0x186   :  { %1540 = vmatprep.subr.bf16.mxu1 %v1539_v45  ;;  %v1108_v45 = vld [vmem:[#allocation7 + $0x130] sm:$0xff] }
 0x187   :  { %v1567_v47 = vpack.c.bf16 %v1109_v46, %v1108_v45 }
 0x189   :  { %1542 = vmatpush3.bf16.msra.mxu1 %v1541_v50  ;;  %v1571_v50 = vpack.c.bf16 %v1111_v49, %v1110_v48 }
 0x18a   :  { %1544 = vmatprep.subr.bf16.mxu1 %v1543_v51  ;;  %v1112_v51 = vld [vmem:[#allocation7 + $0x150] sm:$0xff] }
 0x18b   :  { %v1575_v53 = vpack.c.bf16 %v1113_v52, %v1112_v51 }
 0x18d   :  { %1546 = vmatpush3.bf16.msra.mxu1 %v1545_v56  ;;  %v1579_v56 = vpack.c.bf16 %v1115_v55, %v1114_v54 }
 0x18e   :  { %1548 = vmatprep.subr.bf16.mxu1 %v1547_v57  ;;  %v1116_v57 = vld [vmem:[#allocation7 + $0x170] sm:$0xff] }
 0x18f   :  { %v1583_v61 = vpack.c.bf16 %v1117_v58, %v1116_v57 }
 0x191   :  { %1550 = vmatpush3.bf16.msra.mxu1 %v1549_v0 }
 0x192   :  { %1552 = vmatprep.subr.bf16.mxu1 %v1551_v3 }
 0x195   :  { %1554 = vmatpush3.bf16.msra.mxu1 %v1553_v6 }
 0x196   :  { %1556 = vmatprep.subr.bf16.mxu1 %v1555_v9 }
 0x211   :  { %v1404_v10 = vpop.f32.mrb[4].mxu1 }
 0x212   :  { %v1405_v11 = vpop.f32.mrb[5].mxu1 }
 0x213   :  { %v1406_v12 = vadd.f32 %v1405_v11, %v1404_v10  ;;  %v1407_v13 = vpop.f32.mrb[6].mxu1 }
 0x214   :  { %v1408_v14 = vpop.f32.mrb[7].mxu1 }
 0x215   :  { %v1409_v15 = vadd.f32 %v1408_v14, %v1407_v13  ;;  %v1017_v20 = vadd.f32 %v1406_v12, %v380_v17 }
 0x217   :  { %v1020_v24 = vadd.f32 %v1409_v15, %v380_v17 }
 0x231   :  { %v1426_v18 = vpop.f32.mrb[8].mxu1 }
 0x232   :  { %v1427_v19 = vpop.f32.mrb[9].mxu1 }
 0x233   :  { %v1428_v21 = vadd.f32 %v1427_v19, %v1426_v18  ;;  %v1429_v22 = vpop.f32.mrb[10].mxu1 }
 0x234   :  { %v1430_v23 = vpop.f32.mrb[11].mxu1 }
 0x235   :  { %v1058_v25 = vadd.f32 %v1428_v21, %v1017_v20  ;;  %v1431_v26 = vadd.f32 %v1430_v23, %v1429_v22 }
 0x237   :  { %v1061_v27 = vadd.f32 %v1431_v26, %v1020_v24  ;;  %v1066_v44 = vmax.f32 %v1058_v25, 0.0 }
 0x239   :  { %v1069_v0 = vmax.f32 %v1061_v27, 0.0 }
 0x251   :  { %v973_v30 = vpop.f32.mrb[4].mxu0 }
 0x252   :  { %v1587_v31 = vadd.f32 %v973_v30, %v372_v28  ;;  %v975_v32 = vpop.f32.mrb[5].mxu0 }
 0x253   :  { %v1588_v63 = vadd.f32 %v975_v32, %v376_v29  ;;  %v977_v33 = vpop.f32.mrb[6].mxu0 }
 0x254   :  { %v979_v36 = vpop.f32.mrb[7].mxu0  ;;  %v1064_v39 = vmax.f32 %v1587_v31, 0.0  ;;  %v1589_v40 = vadd.f32 %v977_v33, %v372_v28 }
 0x255   :  { %v1065_v37 = vmax.f32 %v1588_v63, 0.0  ;;  %v1590_v38 = vadd.f32 %v979_v36, %v376_v29 }
 0x256   :  { %v1067_v59 = vmax.f32 %v1589_v40, 0.0 }
 0x257   :  { %v1068_v42 = vmax.f32 %v1590_v38, 0.0  ;;  %1188 = vmatprep.mubr.f32.mxu1 %v1065_v37 }
 0x258   :  { %1189 = vmatmul.mubr.f32.vlgmr.msra.gmra.mrb[12].mxu1 %v1064_v39 }
 0x259   :  { %1558 = vmatpush3.bf16.msra.mxu1 %v1555_v9  ;;  %1193 = vmatprep.mubr.f32.mxu1 %v1068_v42 }
 0x25a   :  { %1560 = vmatprep.subr.bf16.mxu1 %v1559_v41 }
 0x25c   :  { %1194 = vmatmul.mubr.f32.gmra.mrb[14].mxu1 %v1067_v59 }
 0x25d   :  { %1562 = vmatpush3.bf16.msra.mxu1 %v1559_v41  ;;  %1520 = vmatprep.mubr.f32.mxu1 %v1066_v44 }
 0x25e   :  { %1564 = vmatprep.subr.bf16.mxu1 %v1563_v62 }
 0x261   :  { %1566 = vmatpush3.bf16.msra.mxu1 %v1563_v62 }
 0x262   :  { %1568 = vmatprep.subr.bf16.mxu1 %v1567_v47 }
 0x265   :  { %1570 = vmatpush3.bf16.msra.mxu1 %v1567_v47 }
 0x266   :  { %1572 = vmatprep.subr.bf16.mxu1 %v1571_v50 }
 0x269   :  { %1574 = vmatpush3.bf16.msra.mxu1 %v1571_v50 }
 0x26a   :  { %1576 = vmatprep.subr.bf16.mxu1 %v1575_v53 }
 0x26d   :  { %1578 = vmatpush3.bf16.msra.mxu1 %v1575_v53 }
 0x26e   :  { %1580 = vmatprep.subr.bf16.mxu1 %v1579_v56 }
 0x271   :  { %1582 = vmatpush3.bf16.msra.mxu1 %v1579_v56 }
 0x272   :  { %1584 = vmatprep.subr.bf16.mxu1 %v1583_v61 }
 0x275   :  { %1586 = vmatpush3.bf16.msra.mxu1 %v1583_v61 }
 0x278   :  { %1521 = vmatmul.mubr.f32.vlgmr.msra.gmra.mrb[16].mxu1 %v1069_v0 }
 0x32b   :  { %v1464_v1 = vpop.f32.mrb[12].mxu1 }
 0x32c   :  { %v1465_v2 = vpop.f32.mrb[13].mxu1 }
 0x32d   :  { %v1466_v3 = vadd.f32 %v1465_v2, %v1464_v1 }
 0x32f   :  { %v1467_v4 = vpop.f32.mrb[14].mxu1  ;;  %v1191_v10 = vadd.f32 %v1466_v3, %v1387_v7 }
 0x330   :  { %v1468_v5 = vpop.f32.mrb[15].mxu1 }
 0x331   :  { %v1469_v6 = vadd.f32 %v1468_v5, %v1467_v4 }
 0x333   :  { %v1196_v8 = vadd.f32 %v1469_v6, %v1387_v7 }
 0x34b   :  { %v1522_v9 = vpop.f32.mrb[16].mxu1 }
 0x34c   :  { %v1271_v11 = vadd.f32 %v1522_v9, %v1196_v8  ;;  %v1265_v12 = vpop.f32.mrb[17].mxu1 }
 0x34d   :  { %v1266_v13 = vadd.f32 %v1265_v12, %v1191_v10 }
 0x34e   :  { %1741 = vtanh.f32 %v1271_v11 }
 0x34f   :  { %1743 = vtanh.f32 %v1266_v13 }
 0x358   :  { %v1742_v14 = vpop.eup %1741 }
 0x359   :  { %v1744_v15 = vpop.eup %1743  ;;  %1277 = vst [vmem:[%s1996_s5 + $0x8] sm:$0xff] %v1742_v14 }
 0x35a   :  { %1276 = vst [vmem:[%s1996_s5] sm:$0xff] %v1744_v15 }
 0x35b   :  { %1282 = vsyncpa [#allocation3], 1 }
 0x35c   :  { %1283 = vsyncpa [#allocation5], 1 }
 0x35d   :  { %1284 = vsyncpa [#allocation8], 1 }

// kernel: actor_forward.1
= control target key start
LH: loop header
LB: loop body
LE: loop exit
PB: predicated region body
PF: predicated region fallthrough
CT: control target
= control target key end

     0   :  { %10 = vsyncpa [#allocation3], 0  ;;  %s1991_s0 = inlined_call_operand.hbm [shape: f32[16,16], index: 0, kind: input, shape index: {}]   ;;  %s1992_s1 = inlined_call_operand.hbm [shape: bf16[16,512], index: 1, kind: input, shape index: {}]   ;;  %s1993_s2 = inlined_call_operand.hbm [shape: bf16[512,384], index: 2, kind: input, shape index: {}]   ;;  %s1994_s3 = inlined_call_operand.hbm [shape: f32[384,128], index: 3, kind: input, shape index: {}]   ;;  %s1995_s4 = inlined_call_operand.hbm [shape: f32[1,1024], index: 4, kind: input, shape index: {}]   ;;  %s1996_s5 = inlined_call_operand.vmem [shape: f32[16,128], index: 5, kind: output, shape index: {}]  }
   0x1   :  { %11 = vsyncpa [#allocation5], 0 }
   0x2   :  { %12 = vsyncpa [#allocation8], 0  ;;  %s1861_s18 = smov [#allocation4]   ;;  %s1745_s22 = scalar_lea.hbm %s1992_s1, 512 }
   0x3   :  { %s30_s19 = sshll.u32 %s1861_s18, 4  ;;  %p1746_p0 = scmp.ne.s32.totalorder %s1992_s1, %s1745_s22  ;;  %s31_s19 = int_to_ptr.vmem [resolvable:$true] %s30_s19 }
   0x4   :  { %p1749_p1 = scmp.lt.u32.totalorder %s1745_s22, %s1992_s1 }
   0x6   :  { %p1751_p2 = pnand %p1749_p1, %p1746_p0 }
   0x8   :  { %1754 = shalt.err (!%p1751_p2)
}
   0x9   :  { %s1755_s27 = scalar_lea.vmem %s31_s19, 512  ;;  %p1760_p4 = scmp.lt.s32.totalorder %s31_s19, %s31_s19 }
   0xa   :  { %p1756_p3 = scmp.ne.s32.totalorder %s31_s19, %s1755_s27  ;;  %p1761_p5 = scmp.lt.s32.totalorder %s1755_s27, %s1755_s27 }
   0xc   :  { %p1762_p6 = por %p1761_p5, %p1760_p4 }
   0xe   :  { %p1763_p7 = pnand %p1762_p6, %p1756_p3 }
  0x10   :  { %1766 = shalt.err (!%p1763_p7)
}
  0x11   :  { %s1862_s28 = smov 256   ;;  %s1863_s29 = smov 16  }
  0x12   :  { %36 = dma.hbm_to_vmem [thread:$0]  %s1992_s1, 512, %s31_s19, [#allocation5], %s1862_s28, %s1862_s28, %s1863_s29  }
  0x13   :  { %s1864_s7 = smov [#allocation7]   ;;  %s1865_s9 = smov [#allocation2]  }
  0x14   :  { %s54_s8 = sshll.u32 %s1864_s7, 4  ;;  %s18_s10 = sshll.u32 %s1865_s9, 4  ;;  %s55_s8 = int_to_ptr.vmem [resolvable:$true] %s54_s8  ;;  %s19_s10 = int_to_ptr.vmem [resolvable:$true] %s18_s10 }
  0x15   :  { %s1767_s13 = scalar_lea.hbm %s1994_s3, 6144 }
  0x16   :  { %p1768_p8 = scmp.ne.s32.totalorder %s1994_s3, %s1767_s13  ;;  %p1771_p9 = scmp.lt.u32.totalorder %s1767_s13, %s1994_s3 }
  0x18   :  { %p1773_p10 = pnand %p1771_p9, %p1768_p8 }
  0x1a   :  { %1776 = shalt.err (!%p1773_p10)
}
  0x1b   :  { %s1777_s1 = scalar_lea.vmem %s55_s8, 6144  ;;  %p1782_p12 = scmp.lt.s32.totalorder %s55_s8, %s55_s8 }
  0x1c   :  { %p1778_p11 = scmp.ne.s32.totalorder %s55_s8, %s1777_s1  ;;  %p1783_p13 = scmp.lt.s32.totalorder %s1777_s1, %s1777_s1 }
  0x1e   :  { %p1784_p0 = por %p1783_p13, %p1782_p12 }
  0x20   :  { %p1785_p1 = pnand %p1784_p0, %p1778_p11 }
  0x22   :  { %1788 = shalt.err (!%p1785_p1)
}
  0x23   :  { %s1866_s18 = smov 128   ;;  %s1867_s19 = smov 8  }
  0x24   :  { %60 = dma.hbm_to_vmem [thread:$0]  %s1994_s3, 6144, %s55_s8, [#allocation8], %s1866_s18, %s1866_s18, %s1867_s19  }
  0x25   :  { %s1789_s24 = scalar_lea.hbm %s1991_s0, 256 }
  0x26   :  { %p1790_p2 = scmp.ne.s32.totalorder %s1991_s0, %s1789_s24  ;;  %p1793_p3 = scmp.lt.u32.totalorder %s1789_s24, %s1991_s0 }
  0x28   :  { %p1795_p4 = pnand %p1793_p3, %p1790_p2 }
  0x2a   :  { %1798 = shalt.err (!%p1795_p4)
}
  0x2b   :  { %s1799_s29 = scalar_lea.vmem %s19_s10, 256  ;;  %p1804_p6 = scmp.lt.s32.totalorder %s19_s10, %s19_s10 }
  0x2c   :  { %p1800_p5 = scmp.ne.s32.totalorder %s19_s10, %s1799_s29  ;;  %p1805_p7 = scmp.lt.s32.totalorder %s1799_s29, %s1799_s29 }
  0x2e   :  { %p1806_p8 = por %p1805_p7, %p1804_p6 }
  0x30   :  { %p1807_p9 = pnand %p1806_p8, %p1800_p5 }
  0x32   :  { %1810 = shalt.err (!%p1807_p9)
}
  0x33   :  { %24 = dma.hbm_to_vmem [thread:$0]  %s1991_s0, 256, %s19_s10, [#allocation3], %s1866_s18, %s1866_s18, %s1867_s19  }
  0x34   :  { %s1868_s6 = smov [#allocation6]   ;;  %s1811_s11 = scalar_lea.hbm %s1993_s2, 12288 }
  0x35   :  { %s42_s7 = sshll.u32 %s1868_s6, 4  ;;  %p1812_p10 = scmp.ne.s32.totalorder %s1993_s2, %s1811_s11  ;;  %s43_s7 = int_to_ptr.vmem [resolvable:$true] %s42_s7 }
  0x36   :  { %p1815_p11 = scmp.lt.u32.totalorder %s1811_s11, %s1993_s2 }
  0x38   :  { %p1817_p12 = pnand %p1815_p11, %p1812_p10 }
  0x3a   :  { %1820 = shalt.err (!%p1817_p12)
}
  0x3b   :  { %s1821_s16 = scalar_lea.vmem %s43_s7, 12288  ;;  %p1826_p0 = scmp.lt.s32.totalorder %s43_s7, %s43_s7 }
  0x3c   :  { %p1822_p13 = scmp.ne.s32.totalorder %s43_s7, %s1821_s16  ;;  %p1827_p1 = scmp.lt.s32.totalorder %s1821_s16, %s1821_s16 }
  0x3e   :  { %p1828_p2 = por %p1827_p1, %p1826_p0 }
  0x40   :  { %p1829_p3 = pnand %p1828_p2, %p1822_p13 }
  0x42   :  { %1832 = shalt.err (!%p1829_p3)
}
  0x43   :  { %s1869_s0 = smov 192   ;;  %s1870_s10 = smov 12  }
  0x44   :  { %48 = dma.hbm_to_vmem [thread:$0]  %s1993_s2, 12288, %s43_s7, [#allocation5], %s1869_s0, %s1869_s0, %s1870_s10  }
  0x45   :  { %s1871_s18 = smov [#allocation9]   ;;  %s1833_s22 = scalar_lea.hbm %s1995_s4, 128 }
  0x46   :  { %s67_s19 = sshll.u32 %s1871_s18, 4  ;;  %p1834_p4 = scmp.ne.s32.totalorder %s1995_s4, %s1833_s22  ;;  %s68_s19 = int_to_ptr.vmem [resolvable:$true] %s67_s19 }
  0x47   :  { %p1837_p5 = scmp.lt.u32.totalorder %s1833_s22, %s1995_s4 }
  0x49   :  { %p1839_p6 = pnand %p1837_p5, %p1834_p4 }
  0x4b   :  { %1842 = shalt.err (!%p1839_p6)
}
  0x4c   :  { %s1843_s27 = scalar_lea.vmem %s68_s19, 128  ;;  %p1848_p8 = scmp.lt.s32.totalorder %s68_s19, %s68_s19 }
  0x4d   :  { %p1844_p7 = scmp.ne.s32.totalorder %s68_s19, %s1843_s27  ;;  %p1849_p9 = scmp.lt.s32.totalorder %s1843_s27, %s1843_s27 }
  0x4f   :  { %p1850_p10 = por %p1849_p9, %p1848_p8 }
  0x51   :  { %p1851_p11 = pnand %p1850_p10, %p1844_p7 }
  0x53   :  { %1854 = shalt.err (!%p1851_p11)
}
  0x54   :  { %70 = dma.hbm_to_vmem [thread:$0]  %s1995_s4, 128, %s68_s19, [#allocation8]  }
  0x55   :  { %1855 = dma.done.wait [#allocation3], 256  }
  0x56   :  { %1856 = vsyncadd [#allocation3], 4294967040 }
  0x57   :  { %1857 = dma.done.wait [#allocation5], 12800  }
  0x58   :  { %1858 = vsyncadd [#allocation5], 4294954496 }
  0x59   :  { %1859 = dma.done.wait [#allocation8], 6272  }
  0x5a   :  { %1860 = vsyncadd [#allocation8], 4294961024  ;;  %v1872_v0 = vmov 0   ;;  %v1607_v1 = vld [vmem:[#allocation4 + $0x4] ss:$16 sps:$4 sm:$0xff]   ;;  %v91_v4 = vld [vmem:[#allocation2 + $0x8] sm:$0xff]  ;;  %v98_v58 = vlaneseq }
  0x5b   :  { %174 = vmatprep.mubr.bf16.mxu0 %v1872_v0  ;;  %217 = vmatprep.mubr.bf16.mxu1 %v1872_v0  ;;  %v1609_v2 = vld [vmem:[#allocation4] ss:$16 sps:$4 sm:$0xff]   ;;  %v1610_v6 = vld [vmem:[#allocation4 + $0xc] ss:$16 sps:$4 sm:$0xff]   ;;  %vm138_vm0 = vcmask 130048  }
  0x5c   :  { %v90_v3 = vld [vmem:[#allocation2] sm:$0xff]  ;;  %142 = vmatprep.subr.bf16.mxu0 %v1607_v1  ;;  %v1612_v7 = vld [vmem:[#allocation4 + $0x8] ss:$16 sps:$4 sm:$0xff]   ;;  %185 = vmatprep.subr.bf16.mxu1 %v1610_v6  ;;  %v1613_v8 = vld [vmem:[#allocation6] ss:$12 sps:$4 sm:$0xff]   ;;  %v1963_v59 = vshrl.u32 %v98_v58, 7 }
  0x5d   :  { %v92_v5 = vpack.c.bf16 %v91_v4, %v90_v3  ;;  %143 = vmatpush1.bf16.msra.mxu0 %v1609_v2  ;;  %v1615_v9 = vld [vmem:[#allocation6 + $0x4] ss:$12 sps:$4 sm:$0xff]   ;;  %186 = vmatpush1.bf16.msra.mxu1 %v1612_v7  ;;  %v1618_v10 = vld [vmem:[#allocation6 + $0x1c] ss:$12 sps:$4 sm:$0xff]   ;;  %v1621_v12 = vld [vmem:[#allocation6 + $0x34] ss:$12 sps:$4 sm:$0xff]  }
  0x5e   :  { %896 = vmatprep.subr.bf16.mxu0 %v1615_v9  ;;  %v1616_v11 = vld [vmem:[#allocation6 + $0x18] ss:$12 sps:$4 sm:$0xff]   ;;  %v1619_v13 = vld [vmem:[#allocation6 + $0x30] ss:$12 sps:$4 sm:$0xff]   ;;  %v1622_v15 = vld [vmem:[#allocation6 + $0x48] ss:$12 sps:$4 sm:$0xff]  }
  0x5f   :  { %v1624_v14 = vld [vmem:[#allocation6 + $0x4c] ss:$12 sps:$4 sm:$0xff]   ;;  %v1627_v16 = vld [vmem:[#allocation6 + $0x64] ss:$12 sps:$4 sm:$0xff]   ;;  %v1640_v17 = vld [vmem:[#allocation6 + $0xc8] ss:$12 sps:$4 sm:$0xff]  }
  0x60   :  { %1289 = vmatmul.mubr.msk.bf16.vlgmr.msra.gmra.mrb[0].mxu0 %vm138_vm0, %v92_v5  ;;  %1290 = vmatmul.mubr.msk.bf16.vlgmr.msra.gmra.mrb[0].mxu1 %vm138_vm0, %v92_v5  ;;  %v1641_v18 = vld [vmem:[#allocation6 + $0x8] ss:$12 sps:$4 sm:$0xff]   ;;  %v1625_v19 = vld [vmem:[#allocation6 + $0x60] ss:$12 sps:$4 sm:$0xff]   ;;  %v1628_v23 = vld [vmem:[#allocation6 + $0x78] ss:$12 sps:$4 sm:$0xff]  }
  0x61   :  { %897 = vmatpush1.bf16.msra.mxu0 %v1613_v8  ;;  %v1630_v20 = vld [vmem:[#allocation6 + $0x7c] ss:$12 sps:$4 sm:$0xff]   ;;  %1388 = vmatprep.subr.bf16.mxu1 %v1640_v17  ;;  %v1645_v21 = vld [vmem:[#allocation6 + $0xe0] ss:$12 sps:$4 sm:$0xff]   ;;  %v1650_v24 = vld [vmem:[#allocation6 + $0xf8] ss:$12 sps:$4 sm:$0xff]  }
  0x62   :  { %898 = vmatprep.subr.bf16.mxu0 %v1618_v10  ;;  %1389 = vmatpush3.bf16.msra.mxu1 %v1641_v18  ;;  %v1646_v22 = vld [vmem:[#allocation6 + $0x20] ss:$12 sps:$4 sm:$0xff]   ;;  %v1651_v25 = vld [vmem:[#allocation6 + $0x38] ss:$12 sps:$4 sm:$0xff]   ;;  %v1631_v27 = vld [vmem:[#allocation6 + $0x90] ss:$12 sps:$4 sm:$0xff]  }
  0x63   :  { %1390 = vmatprep.subr.bf16.mxu1 %v1645_v21  ;;  %v1633_v26 = vld [vmem:[#allocation6 + $0x94] ss:$12 sps:$4 sm:$0xff]   ;;  %v1655_v28 = vld [vmem:[#allocation6 + $0x110] ss:$12 sps:$4 sm:$0xff]   ;;  %v1636_v30 = vld [vmem:[#allocation6 + $0xac] ss:$12 sps:$4 sm:$0xff]  }
  0x64   :  { %v1656_v29 = vld [vmem:[#allocation6 + $0x50] ss:$12 sps:$4 sm:$0xff]   ;;  %v1660_v31 = vld [vmem:[#allocation6 + $0x128] ss:$12 sps:$4 sm:$0xff]   ;;  %v1665_v35 = vld [vmem:[#allocation6 + $0x140] ss:$12 sps:$4 sm:$0xff]  }
  0x65   :  { %899 = vmatpush1.bf16.msra.mxu0 %v1616_v11  ;;  %v1634_v32 = vld [vmem:[#allocation6 + $0xa8] ss:$12 sps:$4 sm:$0xff]   ;;  %v1639_v33 = vld [vmem:[#allocation6 + $0xc4] ss:$12 sps:$4 sm:$0xff]   ;;  %v1637_v36 = vld [vmem:[#allocation6 + $0xc0] ss:$12 sps:$4 sm:$0xff]  }
  0x66   :  { %900 = vmatprep.subr.bf16.mxu0 %v1621_v12  ;;  %1391 = vmatpush3.bf16.msra.mxu1 %v1646_v22  ;;  %v1661_v34 = vld [vmem:[#allocation6 + $0x68] ss:$12 sps:$4 sm:$0xff]   ;;  %v1666_v38 = vld [vmem:[#allocation6 + $0x80] ss:$12 sps:$4 sm:$0xff]   ;;  %v1642_v39 = vld [vmem:[#allocation6 + $0xd8] ss:$12 sps:$4 sm:$0xff]  }
  0x67   :  { %1392 = vmatprep.subr.bf16.mxu1 %v1650_v24  ;;  %v1644_v37 = vld [vmem:[#allocation6 + $0xdc] ss:$12 sps:$4 sm:$0xff]   ;;  %v1649_v40 = vld [vmem:[#allocation6 + $0xf4] ss:$12 sps:$4 sm:$0xff]   ;;  %v1654_v42 = vld [vmem:[#allocation6 + $0x10c] ss:$12 sps:$4 sm:$0xff]  }
  0x68   :  { %v1647_v41 = vld [vmem:[#allocation6 + $0xf0] ss:$12 sps:$4 sm:$0xff]   ;;  %v1652_v43 = vld [vmem:[#allocation6 + $0x108] ss:$12 sps:$4 sm:$0xff]   ;;  %v1657_v45 = vld [vmem:[#allocation6 + $0x120] ss:$12 sps:$4 sm:$0xff]  }
  0x69   :  { %901 = vmatpush1.bf16.msra.mxu0 %v1619_v13  ;;  %v1659_v44 = vld [vmem:[#allocation6 + $0x124] ss:$12 sps:$4 sm:$0xff]   ;;  %v1664_v46 = vld [vmem:[#allocation6 + $0x13c] ss:$12 sps:$4 sm:$0xff]   ;;  %v1669_v48 = vld [vmem:[#allocation6 + $0x154] ss:$12 sps:$4 sm:$0xff]  }
  0x6a   :  { %902 = vmatprep.subr.bf16.mxu0 %v1624_v14  ;;  %1393 = vmatpush3.bf16.msra.mxu1 %v1651_v25  ;;  %v1662_v47 = vld [vmem:[#allocation6 + $0x138] ss:$12 sps:$4 sm:$0xff]   ;;  %v1667_v50 = vld [vmem:[#allocation6 + $0x150] ss:$12 sps:$4 sm:$0xff]   ;;  %v1672_v54 = vld [vmem:[#allocation6 + $0x168] ss:$12 sps:$4 sm:$0xff]  }
  0x6b   :  { %1394 = vmatprep.subr.bf16.mxu1 %v1655_v28  ;;  %v1670_v49 = vld [vmem:[#allocation6 + $0x158] ss:$12 sps:$4 sm:$0xff]   ;;  %v1675_v53 = vld [vmem:[#allocation6 + $0x170] ss:$12 sps:$4 sm:$0xff]   ;;  %v1680_v57 = vld [vmem:[#allocation6 + $0x248] ss:$12 sps:$4 sm:$0xff]  }
  0x6c   :  { %v1671_v51 = vld [vmem:[#allocation6 + $0x98] ss:$12 sps:$4 sm:$0xff]   ;;  %v1676_v55 = vld [vmem:[#allocation6 + $0xb0] ss:$12 sps:$4 sm:$0xff]   ;;  %v100_v60 = vsub.s32 0, %v1963_v59  ;;  %v104_v62 = vsub.s32 1, %v1963_v59 }
  0x6d   :  { %903 = vmatpush1.bf16.msra.mxu0 %v1622_v15  ;;  %v1674_v52 = vld [vmem:[#allocation6 + $0x16c] ss:$12 sps:$4 sm:$0xff]   ;;  %v1679_v56 = vld [vmem:[#allocation6 + $0x184] ss:$12 sps:$4 sm:$0xff]   ;;  %v87_v61 = vld [vmem:[#allocation9] sm:$0xf] }
  0x6e   :  { %904 = vmatprep.subr.bf16.mxu0 %v1627_v16  ;;  %1395 = vmatpush3.bf16.msra.mxu1 %v1656_v29  ;;  %v108_v63 = vsub.s32 2, %v1963_v59  ;;  %v112_v0 = vsub.s32 3, %v1963_v59  ;;  %v101_v1 = vrot.slane %v87_v61, %v100_v60  ;;  %v105_v2 = vrot.slane %v87_v61, %v104_v62  ;;  %v1711_v58 = vld [vmem:[#allocation6 + $0x218] ss:$12 sps:$4 sm:$0xff]  }
  0x6f   :  { %1396 = vmatprep.subr.bf16.mxu1 %v1660_v31  ;;  %v1681_v31 = vld [vmem:[#allocation6 + $0x188] ss:$12 sps:$4 sm:$0xff]  }
  0x70   :  { %v109_v3 = vrot.slane %v87_v61, %v108_v63  ;;  %v113_v5 = vrot.slane %v87_v61, %v112_v0  ;;  %v1714_v61 = vld [vmem:[#allocation6 + $0x22c] ss:$12 sps:$4 sm:$0xff]   ;;  %v1715_v0 = vld [vmem:[#allocation6 + $0x2f0] ss:$12 sps:$4 sm:$0xff]  }
  0x71   :  { %905 = vmatpush1.bf16.msra.mxu0 %v1625_v19 }
  0x72   :  { %906 = vmatprep.subr.bf16.mxu0 %v1630_v20  ;;  %1397 = vmatpush3.bf16.msra.mxu1 %v1661_v34  ;;  %v1685_v34 = vld [vmem:[#allocation6 + $0x260] ss:$12 sps:$4 sm:$0xff]  }
  0x73   :  { %1398 = vmatprep.subr.bf16.mxu1 %v1665_v35 }
  0x75   :  { %907 = vmatpush1.bf16.msra.mxu0 %v1628_v23 }
  0x76   :  { %908 = vmatprep.subr.bf16.mxu0 %v1633_v26  ;;  %1399 = vmatpush3.bf16.msra.mxu1 %v1666_v38  ;;  %v1686_v38 = vld [vmem:[#allocation6 + $0x1a0] ss:$12 sps:$4 sm:$0xff]  }
  0x77   :  { %1400 = vmatprep.subr.bf16.mxu1 %v1670_v49  ;;  %v1697_v49 = vld [vmem:[#allocation6 + $0x1e0] ss:$12 sps:$4 sm:$0xff]  }
  0x79   :  { %909 = vmatpush1.bf16.msra.mxu0 %v1631_v27 }
  0x7a   :  { %910 = vmatprep.subr.bf16.mxu0 %v1636_v30  ;;  %1401 = vmatpush3.bf16.msra.mxu1 %v1671_v51  ;;  %v1677_v30 = vld [vmem:[#allocation6 + $0x180] ss:$12 sps:$4 sm:$0xff]   ;;  %v1704_v51 = vld [vmem:[#allocation6 + $0x1fc] ss:$12 sps:$4 sm:$0xff]  }
  0x7b   :  { %1402 = vmatprep.subr.bf16.mxu1 %v1675_v53  ;;  %v1702_v53 = vld [vmem:[#allocation6 + $0x1f8] ss:$12 sps:$4 sm:$0xff]  }
  0x7d   :  { %911 = vmatpush1.bf16.msra.mxu0 %v1634_v32 }
  0x7e   :  { %912 = vmatprep.subr.bf16.mxu0 %v1639_v33  ;;  %1403 = vmatpush3.bf16.msra.mxu1 %v1676_v55  ;;  %v1684_v33 = vld [vmem:[#allocation6 + $0x19c] ss:$12 sps:$4 sm:$0xff]   ;;  %v1709_v55 = vld [vmem:[#allocation6 + $0x214] ss:$12 sps:$4 sm:$0xff]  }
  0x7f   :  { %1410 = vmatprep.subr.bf16.mxu1 %v1680_v57  ;;  %v1707_v57 = vld [vmem:[#allocation6 + $0x210] ss:$12 sps:$4 sm:$0xff]  }
  0x81   :  { %913 = vmatpush1.bf16.msra.mxu0 %v1637_v36 }
  0x82   :  { %914 = vmatprep.subr.bf16.mxu0 %v1644_v37  ;;  %v1682_v37 = vld [vmem:[#allocation6 + $0x198] ss:$12 sps:$4 sm:$0xff]  }
  0x85   :  { %915 = vmatpush1.bf16.msra.mxu0 %v1642_v39  ;;  %v1689_v39 = vld [vmem:[#allocation6 + $0x1b4] ss:$12 sps:$4 sm:$0xff]  }
  0x86   :  { %916 = vmatprep.subr.bf16.mxu0 %v1649_v40  ;;  %v1690_v40 = vld [vmem:[#allocation6 + $0x278] ss:$12 sps:$4 sm:$0xff]  }
  0x89   :  { %917 = vmatpush1.bf16.msra.mxu0 %v1647_v41  ;;  %v1687_v41 = vld [vmem:[#allocation6 + $0x1b0] ss:$12 sps:$4 sm:$0xff]  }
  0x8a   :  { %918 = vmatprep.subr.bf16.mxu0 %v1654_v42  ;;  %v1691_v42 = vld [vmem:[#allocation6 + $0x1b8] ss:$12 sps:$4 sm:$0xff]  }
  0x8d   :  { %919 = vmatpush1.bf16.msra.mxu0 %v1652_v43  ;;  %v1694_v43 = vld [vmem:[#allocation6 + $0x1cc] ss:$12 sps:$4 sm:$0xff]  }
  0x8e   :  { %920 = vmatprep.subr.bf16.mxu0 %v1659_v44  ;;  %v1695_v44 = vld [vmem:[#allocation6 + $0x290] ss:$12 sps:$4 sm:$0xff]  }
  0x91   :  { %921 = vmatpush1.bf16.msra.mxu0 %v1657_v45  ;;  %v1692_v45 = vld [vmem:[#allocation6 + $0x1c8] ss:$12 sps:$4 sm:$0xff]  }
  0x92   :  { %922 = vmatprep.subr.bf16.mxu0 %v1664_v46  ;;  %v1696_v46 = vld [vmem:[#allocation6 + $0x1d0] ss:$12 sps:$4 sm:$0xff]  }
  0x95   :  { %923 = vmatpush1.bf16.msra.mxu0 %v1662_v47  ;;  %v1699_v47 = vld [vmem:[#allocation6 + $0x1e4] ss:$12 sps:$4 sm:$0xff]  }
  0x96   :  { %924 = vmatprep.subr.bf16.mxu0 %v1669_v48  ;;  %v1700_v48 = vld [vmem:[#allocation6 + $0x2a8] ss:$12 sps:$4 sm:$0xff]  }
  0x99   :  { %925 = vmatpush1.bf16.msra.mxu0 %v1667_v50  ;;  %v1701_v50 = vld [vmem:[#allocation6 + $0x1e8] ss:$12 sps:$4 sm:$0xff]  }
  0x9a   :  { %926 = vmatprep.subr.bf16.mxu0 %v1674_v52  ;;  %v1705_v52 = vld [vmem:[#allocation6 + $0x2c0] ss:$12 sps:$4 sm:$0xff]  }
  0x9d   :  { %927 = vmatpush1.bf16.msra.mxu0 %v1672_v54  ;;  %v1706_v54 = vld [vmem:[#allocation6 + $0x200] ss:$12 sps:$4 sm:$0xff]  }
  0x9e   :  { %939 = vmatprep.subr.bf16.mxu0 %v1679_v56  ;;  %v1710_v56 = vld [vmem:[#allocation6 + $0x2d8] ss:$12 sps:$4 sm:$0xff]  }
 0x133   :  { %v176_v4 = vpop.f32.mrb[0].mxu0  ;;  %v219_v10 = vpop.f32.mrb[0].mxu1 }
 0x134   :  { %v177_v6 = vadd.f32 %v176_v4, %v101_v1  ;;  %v178_v7 = vpop.f32.mrb[1].mxu0  ;;  %v220_v13 = vadd.f32 %v219_v10, %v109_v3  ;;  %v221_v14 = vpop.f32.mrb[1].mxu1  ;;  %v1717_v4 = vld [vmem:[#allocation6 + $0x240] ss:$12 sps:$4 sm:$0xff]   ;;  %v1726_v10 = vld [vmem:[#allocation6 + $0x288] ss:$12 sps:$4 sm:$0xff]  }
 0x135   :  { %v179_v8 = vadd.f32 %v178_v7, %v105_v2  ;;  %v180_v9 = vpop.f32.mrb[2].mxu0  ;;  %v222_v16 = vadd.f32 %v221_v14, %v113_v5  ;;  %v223_v17 = vpop.f32.mrb[2].mxu1  ;;  %v1725_v7 = vld [vmem:[#allocation6 + $0x274] ss:$12 sps:$4 sm:$0xff]   ;;  %v1732_v14 = vld [vmem:[#allocation6 + $0x2b8] ss:$12 sps:$4 sm:$0xff]  }
 0x136   :  { %v181_v11 = vadd.f32 %v180_v9, %v101_v1  ;;  %v182_v12 = vpop.f32.mrb[3].mxu0  ;;  %v228_v18 = vmax.f32 %v177_v6, 0.0  ;;  %v230_v20 = vmax.f32 %v220_v13, 0.0  ;;  %v224_v21 = vadd.f32 %v223_v17, %v109_v3  ;;  %v225_v22 = vpop.f32.mrb[3].mxu1  ;;  %v1712_v1 = vld [vmem:[#allocation6 + $0x228] ss:$12 sps:$4 sm:$0xff]  }
 0x137   :  { %v183_v15 = vadd.f32 %v182_v12, %v105_v2  ;;  %v229_v23 = vmax.f32 %v179_v8, 0.0  ;;  %v231_v25 = vmax.f32 %v222_v16, 0.0  ;;  %v226_v26 = vadd.f32 %v225_v22, %v113_v5  ;;  %v1716_v2 = vld [vmem:[#allocation6 + $0x230] ss:$12 sps:$4 sm:$0xff]   ;;  %v1720_v6 = vld [vmem:[#allocation6 + $0x258] ss:$12 sps:$4 sm:$0xff]  }
 0x138   :  { %v232_v19 = vmax.f32 %v181_v11, 0.0  ;;  %v234_v28 = vmax.f32 %v224_v21, 0.0  ;;  %v1719_v3 = vld [vmem:[#allocation6 + $0x244] ss:$12 sps:$4 sm:$0xff]   ;;  %v1722_v5 = vld [vmem:[#allocation6 + $0x25c] ss:$12 sps:$4 sm:$0xff]  }
 0x139   :  { %v233_v24 = vmax.f32 %v183_v15, 0.0  ;;  %v235_v32 = vmax.f32 %v226_v26, 0.0  ;;  %v1723_v8 = vld [vmem:[#allocation6 + $0x270] ss:$12 sps:$4 sm:$0xff]   ;;  %v1728_v9 = vld [vmem:[#allocation6 + $0x28c] ss:$12 sps:$4 sm:$0xff]  }
 0x13a   :  { %v236_v27 = vpack.c.bf16 %v232_v19, %v228_v18  ;;  %v1975_v35 = vpack.c.bf16 %v234_v28, %v230_v20  ;;  %v1731_v11 = vld [vmem:[#allocation6 + $0x2a4] ss:$12 sps:$4 sm:$0xff]   ;;  %v1729_v12 = vld [vmem:[#allocation6 + $0x2a0] ss:$12 sps:$4 sm:$0xff]   ;;  %v1734_v13 = vld [vmem:[#allocation6 + $0x2bc] ss:$12 sps:$4 sm:$0xff]  }
 0x13b   :  { %v237_v29 = vpack.c.bf16 %v233_v24, %v229_v23  ;;  %v239_v36 = vpack.c.bf16 %v235_v32, %v231_v25  ;;  %v1737_v15 = vld [vmem:[#allocation6 + $0x2d4] ss:$12 sps:$4 sm:$0xff]   ;;  %v1735_v16 = vld [vmem:[#allocation6 + $0x2d0] ss:$12 sps:$4 sm:$0xff]   ;;  %v1740_v17 = vld [vmem:[#allocation6 + $0x2ec] ss:$12 sps:$4 sm:$0xff]  }
 0x13c   :  { %v1738_v18 = vld [vmem:[#allocation6 + $0x2e8] ss:$12 sps:$4 sm:$0xff]   ;;  %v1086_v19 = vld [vmem:[#allocation7 + $0x80] sm:$0xff]  ;;  %v1089_v26 = vld [vmem:[#allocation7 + $0x98] sm:$0xff] }
 0x13d   :  { %928 = vmatprep.mubr.bf16.mxu0 %v237_v29  ;;  %1014 = vmatprep.mubr.bf16.mxu1 %v237_v29  ;;  %v1087_v20 = vld [vmem:[#allocation7 + $0x88] sm:$0xff]  ;;  %v1070_v22 = vld [vmem:[#allocation7] sm:$0xff]  ;;  %v1088_v25 = vld [vmem:[#allocation7 + $0x90] sm:$0xff] }
 0x13e   :  { %929 = vmatmul.mubr.bf16.vlgmr.msra.gmra.mrb[4].mxu0 %v236_v27  ;;  %1015 = vmatmul.mubr.bf16.vlgmr.msra.gmra.mrb[4].mxu1 %v236_v27  ;;  %v1523_v21 = vpack.c.bf16 %v1087_v20, %v1086_v19  ;;  %v1071_v23 = vld [vmem:[#allocation7 + $0x8] sm:$0xff]  ;;  %v1527_v27 = vpack.c.bf16 %v1089_v26, %v1088_v25  ;;  %v1072_v28 = vld [vmem:[#allocation7 + $0x10] sm:$0xff]  ;;  %v1073_v29 = vld [vmem:[#allocation7 + $0x18] sm:$0xff] }
 0x13f   :  { %940 = vmatpush1.bf16.msra.mxu0 %v1677_v30  ;;  %1411 = vmatpush3.bf16.msra.mxu1 %v1681_v31  ;;  %v1525_v24 = vpack.c.bf16 %v1071_v23, %v1070_v22  ;;  %v1090_v30 = vld [vmem:[#allocation7 + $0xa0] sm:$0xff]  ;;  %v1529_v31 = vpack.c.bf16 %v1073_v29, %v1072_v28  ;;  %v1091_v32 = vld [vmem:[#allocation7 + $0xa8] sm:$0xff] }
 0x140   :  { %941 = vmatprep.subr.bf16.mxu0 %v1684_v33  ;;  %1412 = vmatprep.subr.bf16.mxu1 %v1685_v34  ;;  %v1074_v33 = vld [vmem:[#allocation7 + $0x20] sm:$0xff]  ;;  %v1075_v34 = vld [vmem:[#allocation7 + $0x28] sm:$0xff] }
 0x141   :  { %1055 = vmatprep.mubr.bf16.mxu1 %v239_v36  ;;  %971 = vmatprep.mubr.bf16.mxu0 %v239_v36  ;;  %v1092_v36 = vld [vmem:[#allocation7 + $0xb0] sm:$0xff] }
 0x143   :  { %942 = vmatpush1.bf16.msra.mxu0 %v1682_v37  ;;  %1413 = vmatpush3.bf16.msra.mxu1 %v1686_v38  ;;  %v1093_v37 = vld [vmem:[#allocation7 + $0xb8] sm:$0xff]  ;;  %v1533_v38 = vpack.c.bf16 %v1075_v34, %v1074_v33  ;;  %v1104_v34 = vld [vmem:[#allocation7 + $0x110] sm:$0xff] }
 0x144   :  { %943 = vmatprep.subr.bf16.mxu0 %v1689_v39  ;;  %1414 = vmatprep.subr.bf16.mxu1 %v1690_v40  ;;  %v1535_v39 = vpack.c.bf16 %v1093_v37, %v1092_v36  ;;  %v1076_v40 = vld [vmem:[#allocation7 + $0x30] sm:$0xff] }
 0x147   :  { %944 = vmatpush1.bf16.msra.mxu0 %v1687_v41  ;;  %1415 = vmatpush3.bf16.msra.mxu1 %v1691_v42  ;;  %v1077_v41 = vld [vmem:[#allocation7 + $0x38] sm:$0xff]  ;;  %v1094_v42 = vld [vmem:[#allocation7 + $0xc0] sm:$0xff] }
 0x148   :  { %945 = vmatprep.subr.bf16.mxu0 %v1694_v43  ;;  %1416 = vmatprep.subr.bf16.mxu1 %v1695_v44  ;;  %v1095_v43 = vld [vmem:[#allocation7 + $0xc8] sm:$0xff]  ;;  %v1537_v44 = vpack.c.bf16 %v1077_v41, %v1076_v40 }
 0x14b   :  { %946 = vmatpush1.bf16.msra.mxu0 %v1692_v45  ;;  %1417 = vmatpush3.bf16.msra.mxu1 %v1696_v46  ;;  %v1539_v45 = vpack.c.bf16 %v1095_v43, %v1094_v42  ;;  %v1078_v46 = vld [vmem:[#allocation7 + $0x40] sm:$0xff] }
 0x14c   :  { %947 = vmatprep.subr.bf16.mxu0 %v1699_v47  ;;  %1418 = vmatprep.subr.bf16.mxu1 %v1700_v48  ;;  %v1079_v47 = vld [vmem:[#allocation7 + $0x48] sm:$0xff]  ;;  %v1096_v48 = vld [vmem:[#allocation7 + $0xd0] sm:$0xff]  ;;  %v1106_v43 = vld [vmem:[#allocation7 + $0x120] sm:$0xff] }
 0x14f   :  { %948 = vmatpush1.bf16.msra.mxu0 %v1697_v49  ;;  %1419 = vmatpush3.bf16.msra.mxu1 %v1701_v50  ;;  %v1097_v49 = vld [vmem:[#allocation7 + $0xd8] sm:$0xff]  ;;  %v1541_v50 = vpack.c.bf16 %v1079_v47, %v1078_v46 }
 0x150   :  { %949 = vmatprep.subr.bf16.mxu0 %v1704_v51  ;;  %1420 = vmatprep.subr.bf16.mxu1 %v1705_v52  ;;  %v1543_v51 = vpack.c.bf16 %v1097_v49, %v1096_v48  ;;  %v1080_v52 = vld [vmem:[#allocation7 + $0x50] sm:$0xff]  ;;  %v1109_v46 = vld [vmem:[#allocation7 + $0x138] sm:$0xff]  ;;  %v1110_v48 = vld [vmem:[#allocation7 + $0x140] sm:$0xff] }
 0x151   :  { %v1111_v49 = vld [vmem:[#allocation7 + $0x148] sm:$0xff] }
 0x153   :  { %950 = vmatpush1.bf16.msra.mxu0 %v1702_v53  ;;  %1421 = vmatpush3.bf16.msra.mxu1 %v1706_v54  ;;  %v1081_v53 = vld [vmem:[#allocation7 + $0x58] sm:$0xff]  ;;  %v1098_v54 = vld [vmem:[#allocation7 + $0xe0] sm:$0xff] }
 0x154   :  { %951 = vmatprep.subr.bf16.mxu0 %v1709_v55  ;;  %1422 = vmatprep.subr.bf16.mxu1 %v1710_v56  ;;  %v1099_v55 = vld [vmem:[#allocation7 + $0xe8] sm:$0xff]  ;;  %v1545_v56 = vpack.c.bf16 %v1081_v53, %v1080_v52  ;;  %v1113_v52 = vld [vmem:[#allocation7 + $0x158] sm:$0xff] }
 0x157   :  { %952 = vmatpush1.bf16.msra.mxu0 %v1707_v57  ;;  %1423 = vmatpush3.bf16.msra.mxu1 %v1711_v58  ;;  %v1547_v57 = vpack.c.bf16 %v1099_v55, %v1098_v54  ;;  %v1082_v58 = vld [vmem:[#allocation7 + $0x60] sm:$0xff]  ;;  %v1115_v55 = vld [vmem:[#allocation7 + $0x168] sm:$0xff] }
 0x158   :  { %953 = vmatprep.subr.bf16.mxu0 %v1714_v61  ;;  %1424 = vmatprep.subr.bf16.mxu1 %v1715_v0  ;;  %v1083_v61 = vld [vmem:[#allocation7 + $0x68] sm:$0xff]  ;;  %v1114_v54 = vld [vmem:[#allocation7 + $0x160] sm:$0xff] }
 0x159   :  { %v1549_v0 = vpack.c.bf16 %v1083_v61, %v1082_v58  ;;  %v1117_v58 = vld [vmem:[#allocation7 + $0x178] sm:$0xff] }
 0x15b   :  { %954 = vmatpush1.bf16.msra.mxu0 %v1712_v1  ;;  %1425 = vmatpush3.bf16.msra.mxu1 %v1716_v2  ;;  %v1100_v1 = vld [vmem:[#allocation7 + $0xf0] sm:$0xff]  ;;  %v1101_v2 = vld [vmem:[#allocation7 + $0xf8] sm:$0xff] }
 0x15c   :  { %955 = vmatprep.subr.bf16.mxu0 %v1719_v3  ;;  %1524 = vmatprep.subr.bf16.mxu1 %v1523_v21  ;;  %v1551_v3 = vpack.c.bf16 %v1101_v2, %v1100_v1 }
 0x15e   :  { %1056 = vmatmul.mubr.bf16.vlgmr.msra.gmra.mrb[8].mxu1 %v1975_v35 }
 0x15f   :  { %956 = vmatpush1.bf16.msra.mxu0 %v1717_v4  ;;  %1526 = vmatpush3.bf16.msra.mxu1 %v1525_v24  ;;  %v1084_v4 = vld [vmem:[#allocation7 + $0x70] sm:$0xff] }
 0x160   :  { %957 = vmatprep.subr.bf16.mxu0 %v1722_v5  ;;  %1528 = vmatprep.subr.bf16.mxu1 %v1527_v27  ;;  %v1085_v5 = vld [vmem:[#allocation7 + $0x78] sm:$0xff] }
 0x163   :  { %958 = vmatpush1.bf16.msra.mxu0 %v1720_v6  ;;  %1530 = vmatpush3.bf16.msra.mxu1 %v1529_v31  ;;  %v1553_v6 = vpack.c.bf16 %v1085_v5, %v1084_v4 }
 0x164   :  { %959 = vmatprep.subr.bf16.mxu0 %v1725_v7  ;;  %v1102_v7 = vld [vmem:[#allocation7 + $0x100] sm:$0xff] }
 0x167   :  { %960 = vmatpush1.bf16.msra.mxu0 %v1723_v8  ;;  %v1103_v8 = vld [vmem:[#allocation7 + $0x108] sm:$0xff] }
 0x168   :  { %961 = vmatprep.subr.bf16.mxu0 %v1728_v9  ;;  %v1555_v9 = vpack.c.bf16 %v1103_v8, %v1102_v7  ;;  %v1387_v7 = vld [vmem:[#allocation9 + $0x7] ss:$0 sm:$0xff] }
 0x16b   :  { %962 = vmatpush1.bf16.msra.mxu0 %v1726_v10 }
 0x16c   :  { %963 = vmatprep.subr.bf16.mxu0 %v1731_v11 }
 0x16f   :  { %964 = vmatpush1.bf16.msra.mxu0 %v1729_v12 }
 0x170   :  { %965 = vmatprep.subr.bf16.mxu0 %v1734_v13 }
 0x173   :  { %966 = vmatpush1.bf16.msra.mxu0 %v1732_v14 }
 0x174   :  { %967 = vmatprep.subr.bf16.mxu0 %v1737_v15 }
 0x177   :  { %968 = vmatpush1.bf16.msra.mxu0 %v1735_v16  ;;  %v88_v16 = vld [vmem:[#allocation9 + $0x4] sm:$0x7] }
 0x178   :  { %969 = vmatprep.subr.bf16.mxu0 %v1740_v17  ;;  %v380_v17 = vrot.slane %v88_v16, %v108_v63  ;;  %v372_v28 = vrot.slane %v88_v16, %v100_v60  ;;  %v376_v29 = vrot.slane %v88_v16, %v104_v62  ;;  %v1107_v60 = vld [vmem:[#allocation7 + $0x128] sm:$0xff] }
 0x179   :  { %v1563_v62 = vpack.c.bf16 %v1107_v60, %v1106_v43 }
 0x17b   :  { %970 = vmatpush1.bf16.msra.mxu0 %v1738_v18 }
 0x17e   :  { %972 = vmatmul.mubr.bf16.vlgmr.msra.gmra.mrb[4].mxu0 %v1975_v35  ;;  %v1531_v35 = vpack.c.bf16 %v1091_v32, %v1090_v30 }
 0x180   :  { %1532 = vmatprep.subr.bf16.mxu1 %v1531_v35  ;;  %v1105_v35 = vld [vmem:[#allocation7 + $0x118] sm:$0xff] }
 0x181   :  { %1534 = vmatpush3.bf16.msra.mxu1 %v1533_v38  ;;  %v1559_v41 = vpack.c.bf16 %v1105_v35, %v1104_v34 }
 0x182   :  { %1536 = vmatprep.subr.bf16.mxu1 %v1535_v39 }
 0x185   :  { %1538 = vmatpush3.bf16.msra.mxu1 %v1537_v44 }
 0x186   :  { %1540 = vmatprep.subr.bf16.mxu1 %v1539_v45  ;;  %v1108_v45 = vld [vmem:[#allocation7 + $0x130] sm:$0xff] }
 0x187   :  { %v1567_v47 = vpack.c.bf16 %v1109_v46, %v1108_v45 }
 0x189   :  { %1542 = vmatpush3.bf16.msra.mxu1 %v1541_v50  ;;  %v1571_v50 = vpack.c.bf16 %v1111_v49, %v1110_v48 }
 0x18a   :  { %1544 = vmatprep.subr.bf16.mxu1 %v1543_v51  ;;  %v1112_v51 = vld [vmem:[#allocation7 + $0x150] sm:$0xff] }
 0x18b   :  { %v1575_v53 = vpack.c.bf16 %v1113_v52, %v1112_v51 }
 0x18d   :  { %1546 = vmatpush3.bf16.msra.mxu1 %v1545_v56  ;;  %v1579_v56 = vpack.c.bf16 %v1115_v55, %v1114_v54 }
 0x18e   :  { %1548 = vmatprep.subr.bf16.mxu1 %v1547_v57  ;;  %v1116_v57 = vld [vmem:[#allocation7 + $0x170] sm:$0xff] }
 0x18f   :  { %v1583_v61 = vpack.c.bf16 %v1117_v58, %v1116_v57 }
 0x191   :  { %1550 = vmatpush3.bf16.msra.mxu1 %v1549_v0 }
 0x192   :  { %1552 = vmatprep.subr.bf16.mxu1 %v1551_v3 }
 0x195   :  { %1554 = vmatpush3.bf16.msra.mxu1 %v1553_v6 }
 0x196   :  { %1556 = vmatprep.subr.bf16.mxu1 %v1555_v9 }
 0x211   :  { %v1404_v10 = vpop.f32.mrb[4].mxu1 }
 0x212   :  { %v1405_v11 = vpop.f32.mrb[5].mxu1 }
 0x213   :  { %v1406_v12 = vadd.f32 %v1405_v11, %v1404_v10  ;;  %v1407_v13 = vpop.f32.mrb[6].mxu1 }
 0x214   :  { %v1408_v14 = vpop.f32.mrb[7].mxu1 }
 0x215   :  { %v1409_v15 = vadd.f32 %v1408_v14, %v1407_v13  ;;  %v1017_v20 = vadd.f32 %v1406_v12, %v380_v17 }
 0x217   :  { %v1020_v24 = vadd.f32 %v1409_v15, %v380_v17 }
 0x231   :  { %v1426_v18 = vpop.f32.mrb[8].mxu1 }
 0x232   :  { %v1427_v19 = vpop.f32.mrb[9].mxu1 }
 0x233   :  { %v1428_v21 = vadd.f32 %v1427_v19, %v1426_v18  ;;  %v1429_v22 = vpop.f32.mrb[10].mxu1 }
 0x234   :  { %v1430_v23 = vpop.f32.mrb[11].mxu1 }
 0x235   :  { %v1058_v25 = vadd.f32 %v1428_v21, %v1017_v20  ;;  %v1431_v26 = vadd.f32 %v1430_v23, %v1429_v22 }
 0x237   :  { %v1061_v27 = vadd.f32 %v1431_v26, %v1020_v24  ;;  %v1066_v44 = vmax.f32 %v1058_v25, 0.0 }
 0x239   :  { %v1069_v0 = vmax.f32 %v1061_v27, 0.0 }
 0x251   :  { %v973_v30 = vpop.f32.mrb[4].mxu0 }
 0x252   :  { %v1587_v31 = vadd.f32 %v973_v30, %v372_v28  ;;  %v975_v32 = vpop.f32.mrb[5].mxu0 }
 0x253   :  { %v1588_v63 = vadd.f32 %v975_v32, %v376_v29  ;;  %v977_v33 = vpop.f32.mrb[6].mxu0 }
 0x254   :  { %v979_v36 = vpop.f32.mrb[7].mxu0  ;;  %v1064_v39 = vmax.f32 %v1587_v31, 0.0  ;;  %v1589_v40 = vadd.f32 %v977_v33, %v372_v28 }
 0x255   :  { %v1065_v37 = vmax.f32 %v1588_v63, 0.0  ;;  %v1590_v38 = vadd.f32 %v979_v36, %v376_v29 }
 0x256   :  { %v1067_v59 = vmax.f32 %v1589_v40, 0.0 }
 0x257   :  { %v1068_v42 = vmax.f32 %v1590_v38, 0.0  ;;  %1188 = vmatprep.mubr.f32.mxu1 %v1065_v37 }
 0x258   :  { %1189 = vmatmul.mubr.f32.vlgmr.msra.gmra.mrb[12].mxu1 %v1064_v39 }
 0x259   :  { %1558 = vmatpush3.bf16.msra.mxu1 %v1555_v9  ;;  %1193 = vmatprep.mubr.f32.mxu1 %v1068_v42 }
 0x25a   :  { %1560 = vmatprep.subr.bf16.mxu1 %v1559_v41 }
 0x25c   :  { %1194 = vmatmul.mubr.f32.gmra.mrb[14].mxu1 %v1067_v59 }
 0x25d   :  { %1562 = vmatpush3.bf16.msra.mxu1 %v1559_v41  ;;  %1520 = vmatprep.mubr.f32.mxu1 %v1066_v44 }
 0x25e   :  { %1564 = vmatprep.subr.bf16.mxu1 %v1563_v62 }
 0x261   :  { %1566 = vmatpush3.bf16.msra.mxu1 %v1563_v62 }
 0x262   :  { %1568 = vmatprep.subr.bf16.mxu1 %v1567_v47 }
 0x265   :  { %1570 = vmatpush3.bf16.msra.mxu1 %v1567_v47 }
 0x266   :  { %1572 = vmatprep.subr.bf16.mxu1 %v1571_v50 }
 0x269   :  { %1574 = vmatpush3.bf16.msra.mxu1 %v1571_v50 }
 0x26a   :  { %1576 = vmatprep.subr.bf16.mxu1 %v1575_v53 }
 0x26d   :  { %1578 = vmatpush3.bf16.msra.mxu1 %v1575_v53 }
 0x26e   :  { %1580 = vmatprep.subr.bf16.mxu1 %v1579_v56 }
 0x271   :  { %1582 = vmatpush3.bf16.msra.mxu1 %v1579_v56 }
 0x272   :  { %1584 = vmatprep.subr.bf16.mxu1 %v1583_v61 }
 0x275   :  { %1586 = vmatpush3.bf16.msra.mxu1 %v1583_v61 }
 0x278   :  { %1521 = vmatmul.mubr.f32.vlgmr.msra.gmra.mrb[16].mxu1 %v1069_v0 }
 0x32b   :  { %v1464_v1 = vpop.f32.mrb[12].mxu1 }
 0x32c   :  { %v1465_v2 = vpop.f32.mrb[13].mxu1 }
 0x32d   :  { %v1466_v3 = vadd.f32 %v1465_v2, %v1464_v1 }
 0x32f   :  { %v1467_v4 = vpop.f32.mrb[14].mxu1  ;;  %v1191_v10 = vadd.f32 %v1466_v3, %v1387_v7 }
 0x330   :  { %v1468_v5 = vpop.f32.mrb[15].mxu1 }
 0x331   :  { %v1469_v6 = vadd.f32 %v1468_v5, %v1467_v4 }
 0x333   :  { %v1196_v8 = vadd.f32 %v1469_v6, %v1387_v7 }
 0x34b   :  { %v1522_v9 = vpop.f32.mrb[16].mxu1 }
 0x34c   :  { %v1271_v11 = vadd.f32 %v1522_v9, %v1196_v8  ;;  %v1265_v12 = vpop.f32.mrb[17].mxu1 }
 0x34d   :  { %v1266_v13 = vadd.f32 %v1265_v12, %v1191_v10 }
 0x34e   :  { %1741 = vtanh.f32 %v1271_v11 }
 0x34f   :  { %1743 = vtanh.f32 %v1266_v13 }
 0x358   :  { %v1742_v14 = vpop.eup %1741 }
 0x359   :  { %v1744_v15 = vpop.eup %1743  ;;  %1277 = vst [vmem:[%s1996_s5 + $0x8] sm:$0xff] %v1742_v14 }
 0x35a   :  { %1276 = vst [vmem:[%s1996_s5] sm:$0xff] %v1744_v15 }
 0x35b   :  { %1282 = vsyncpa [#allocation3], 1 }
 0x35c   :  { %1283 = vsyncpa [#allocation5], 1 }
 0x35d   :  { %1284 = vsyncpa [#allocation8], 1 }

</bundles_post_ra>
